<compile_context>
chip_gen: v7x
topology: tpu7x:2x2x1
jax: 0.10.0
libtpu: 0.0.40
codegen_flags: <defaults>
</compile_context>

<pallas_src>
import functools

import jax
import jax.numpy as jnp
import numpy as np
from jax.experimental import pallas as pl
from jax.experimental.pallas import tpu as pltpu


def _pad8(n):
    return ((n + 7) // 8) * 8


def _pad128(n):
    return ((n + 127) // 128) * 128


def _wpack_offsets(H, Vp, MMp):
    """Lane-aligned column offsets for the packed H-row weight array."""
    G = 4 * H
    o_w2 = 0
    o_wih_m = _pad128(H)
    o_whh = o_wih_m + _pad128(G)
    o_wo = o_whh + _pad128(G)
    o_wm = o_wo + Vp
    total = o_wm + MMp
    return o_w2, o_wih_m, o_whh, o_wo, o_wm, total


def make_params(key, nb_features=2, emb_size=50, mem_size=50, mem_len=10,
                hidden_size=32, vocab_size=10):
    ks = jax.random.split(key, 12)
    f32 = jnp.float32

    def init(k, shape, scale=0.1):
        return (scale * jax.random.normal(k, shape)).astype(f32)

    H, E, V, ML, MS = hidden_size, emb_size, vocab_size, mem_len, mem_size
    return dict(
        w1=init(ks[0], (nb_features, H)), b1=init(ks[1], (1, H)),
        w2=init(ks[2], (H, H)),           b2=init(ks[3], (1, H)),
        wm=init(ks[4], (H, ML * MS)),     bm=init(ks[5], (1, ML * MS)),
        wr=init(ks[6], (ML * MS, H)),     br=init(ks[7], (1, H)),
        # LSTM input weight split into [emb part, mem part] (concat input)
        wih_e=init(ks[8], (E, 4 * H)),
        wih_m=init(ks[9], (H, 4 * H)),
        bih=jnp.zeros((1, 4 * H), f32),
        whh=init(ks[10], (H, 4 * H)),
        bhh=jnp.zeros((1, 4 * H), f32),
        wo=init(ks[11], (H, V)),          bo=jnp.zeros((1, V), f32),
        emb=init(jax.random.fold_in(key, 99), (V, E)),
    )


def prepare_params(params, mem_len=10, mem_size=50):
    """One-time, cached weight prep: padding, packing, bias folding."""
    f32 = jnp.float32
    H = params["w1"].shape[1]
    V = params["wo"].shape[1]
    MM = mem_len * mem_size
    MMp, Vp, G = _pad128(MM), _pad128(V), 4 * H
    o_w2, o_wih_m, o_whh, o_wo, o_wm, wtot = _wpack_offsets(H, Vp, MMp)

    # Packed H-row weights: [w2 | wih_m | whh | wo | wm], all lane-aligned.
    wpack = jnp.zeros((H, wtot), f32)
    wpack = wpack.at[:, o_w2:o_w2 + H].set(params["w2"])
    wpack = wpack.at[:, o_wih_m:o_wih_m + G].set(params["wih_m"])
    wpack = wpack.at[:, o_whh:o_whh + G].set(params["whh"])
    wpack = wpack.at[:, o_wo:o_wo + V].set(params["wo"])
    wpack = wpack.at[:, o_wm:o_wm + MM].set(params["wm"])

    # Packed biases: rows = [b1, b2, br, bm, bo, b_ih + b_hh], zero padded.
    bw = max(MMp, Vp, G)
    bpack = jnp.zeros((8, bw), f32)
    bpack = bpack.at[0, :H].set(params["b1"][0])
    bpack = bpack.at[1, :H].set(params["b2"][0])
    bpack = bpack.at[2, :H].set(params["br"][0])
    bpack = bpack.at[3, :MM].set(params["bm"][0])
    bpack = bpack.at[4, :V].set(params["bo"][0])
    bpack = bpack.at[5, :G].set((params["bih"] + params["bhh"])[0])

    wr_p = jnp.zeros((MMp, H), f32).at[:MM, :].set(params["wr"])

    return dict(w1=params["w1"], wih_e=params["wih_e"], wr=wr_p,
                wpack=wpack, bpack=bpack, emb=params["emb"])


def simple_forward(X, M, T, prep, mem_len=10, mem_size=50, vocab_size=10):
    del M  # unused by the reference forward pass
    f32 = jnp.float32
    F, H = prep["w1"].shape
    V = vocab_size
    N = X.shape[0]
    L = T.shape[1]
    MM = mem_len * mem_size
    MMp, Vp, G = _pad128(MM), _pad128(V), 4 * H
    Np = _pad8(N)
    o_w2, o_wih_m, o_whh, o_wo, o_wm, _ = _wpack_offsets(H, Vp, MMp)

    # Tiny per-call prep (constant-folded under jit: static N/Np) + emb gather.
    Xp = jnp.zeros((Np, F), f32).at[:N].set(X)
    maskT = (jnp.zeros((1, Np), f32).at[0, :N].set(1.0)) * (1.0 / N)
    temb = prep["emb"][T[0]]                      # (L, E) embedding gather (glue)

    def kernel(x_ref, maskT_ref, temb_ref, w1_ref, wihE_ref, wr_ref,
               wpack_ref, bpack_ref, om_ref, ot_ref):
        # ---- unpack packed operands (one-time, off the serial path) ----
        b1 = bpack_ref[0:1, :H]
        b2 = bpack_ref[1:2, :H]
        br = bpack_ref[2:3, :H]
        bm = bpack_ref[3:4, :MMp]
        bo = bpack_ref[4:5, :Vp]
        bg = bpack_ref[5:6, :G]                   # b_ih + b_hh, fused

        w2 = wpack_ref[:, o_w2:o_w2 + H]
        wih_m = wpack_ref[:, o_wih_m:o_wih_m + G]
        whh = wpack_ref[:, o_whh:o_whh + G]       # (H, 4H) resident all steps
        wo = wpack_ref[:, o_wo:o_wo + Vp]
        wm = wpack_ref[:, o_wm:o_wm + MMp]

        # ---- repr_features: Linear -> ReLU -> Linear -> ReLU ----
        h1 = jnp.maximum(
            jnp.dot(x_ref[...], w1_ref[...], preferred_element_type=f32) + b1,
            0.0)
        h2 = jnp.maximum(
            jnp.dot(h1, w2, preferred_element_type=f32) + b2, 0.0)

        # ---- pred_mem_val (lane-padded, lane-dense store) ----
        om = jnp.dot(h2, wm, preferred_element_type=f32) + bm     # (Np, MMp)
        om_ref[...] = om

        # ---- mem_repr masked mean via matmul reduction (mask pre-scaled 1/N)
        om_sum = jnp.dot(maskT_ref[...], om, preferred_element_type=f32)  # (1, MMp)
        m_mean = jnp.dot(om_sum, wr_ref[...], preferred_element_type=f32) + br

        # ---- fused input-gate precompute: (L, 4H), gate order (i, f, g, o)
        gate_bias = jnp.dot(m_mean, wih_m, preferred_element_type=f32) + bg
        xg = jnp.dot(temb_ref[...], wihE_ref[...],
                     preferred_element_type=f32) + gate_bias      # (L, 4H)

        # ---- LSTM recurrence: one fused (1,4H) matmul + 2 fused EUP passes
        #      per step, h/c kept in vregs, fully unrolled (L is small) ----
        h = jnp.zeros((1, H), f32)
        c = jnp.zeros((1, H), f32)
        hs = []
        for t in range(L):
            gates = xg[t:t + 1, :] + jnp.dot(h, whh,
                                             preferred_element_type=f32)
            sg = jax.nn.sigmoid(gates)            # one sigmoid pass (i, f, o)
            th = jnp.tanh(gates)                  # one tanh pass (g)
            i_g = sg[:, 0:H]
            f_g = sg[:, H:2 * H]
            g_g = th[:, 2 * H:3 * H]
            o_g = sg[:, 3 * H:4 * H]
            c = f_g * c + i_g * g_g
            h = o_g * jnp.tanh(c)
            hs.append(h)

        # ---- text_out over all timesteps, single lane-dense store ----
        hs_all = jnp.concatenate(hs, axis=0)                      # (L, H)
        ot_ref[...] = jnp.dot(hs_all, wo, preferred_element_type=f32) + bo

    vmem = pl.BlockSpec(memory_space=pltpu.MemorySpace.VMEM)
    in_args = (Xp, maskT, temb, prep["w1"], prep["wih_e"], prep["wr"],
               prep["wpack"], prep["bpack"])

    om_pad, ot_pad = pl.pallas_call(
        kernel,
        out_shape=(jax.ShapeDtypeStruct((Np, MMp), f32),
                   jax.ShapeDtypeStruct((L, Vp), f32)),
        in_specs=[vmem] * len(in_args),
        out_specs=(vmem, vmem),
    )(*in_args)

    om_val = om_pad[:N, :MM].reshape(N * mem_len, mem_size)
    ot = ot_pad[:, :V]
    return om_val, ot


def reference_forward(X, T, params, mem_len=10, mem_size=50):
    """Pure-JAX reference replicating the PyTorch semantics."""
    H = params["w1"].shape[1]
    h1 = jnp.maximum(X @ params["w1"] + params["b1"], 0.0)
    h2 = jnp.maximum(h1 @ params["w2"] + params["b2"], 0.0)
    om = h2 @ params["wm"] + params["bm"]
    m = om @ params["wr"] + params["br"]
    m_mean = jnp.mean(m, axis=0, keepdims=True)
    temb = params["emb"][T[0]]
    xg = temb @ params["wih_e"] + m_mean @ params["wih_m"] + params["bih"]

    def cell(carry, xg_t):
        h, c = carry
        gates = xg_t[None, :] + h @ params["whh"] + params["bhh"]
        i_g = jax.nn.sigmoid(gates[:, 0:H])
        f_g = jax.nn.sigmoid(gates[:, H:2 * H])
        g_g = jnp.tanh(gates[:, 2 * H:3 * H])
        o_g = jax.nn.sigmoid(gates[:, 3 * H:4 * H])
        c = f_g * c + i_g * g_g
        h = o_g * jnp.tanh(c)
        return (h, c), h[0]

    (_, _), hs = jax.lax.scan(cell, (jnp.zeros((1, H)), jnp.zeros((1, H))), xg)
    ot = hs @ params["wo"] + params["bo"]
    return om.reshape(-1, mem_size), ot


if __name__ == "__main__":
    key = jax.random.PRNGKey(0)
    kx, kt, kp = jax.random.split(key, 3)

    # Small shapes consistent with the module defaults.
    N, F, E, MS, ML, H, V = 10, 2, 50, 50, 10, 32, 10
    L = 8  # sequence length; batch of T is 1 (required by torch.cat in forward)

    params = make_params(kp, nb_features=F, emb_size=E, mem_size=MS,
                         mem_len=ML, hidden_size=H, vocab_size=V)
    X = jax.random.normal(kx, (N, F), dtype=jnp.float32)
    M = jnp.zeros((N, ML, MS), dtype=jnp.float32)   # unused, mirrors signature
    T = jax.random.randint(kt, (1, L), 0, V, dtype=jnp.int32)

    # One-time cached weight prep (hoisted out of the per-call path).
    prep = prepare_params(params, mem_len=ML, mem_size=MS)
    prep = jax.tree_util.tree_map(jax.block_until_ready, prep)

    fwd = jax.jit(functools.partial(simple_forward, mem_len=ML, mem_size=MS,
                                    vocab_size=V))
    om_val, ot = fwd(X, M, T, prep)
    jax.block_until_ready((om_val, ot))

    om_ref, ot_ref = reference_forward(X, T, params, mem_len=ML, mem_size=MS)
    np.testing.assert_allclose(np.asarray(om_val), np.asarray(om_ref),
                               rtol=1e-4, atol=1e-4)
    np.testing.assert_allclose(np.asarray(ot), np.asarray(ot_ref),
                               rtol=1e-4, atol=1e-4)

    assert om_val.shape == (N * ML, MS) and ot.shape == (L, V)
    print("KERNEL_OK")
</pallas_src>

<mosaic_0001>
module attributes {stable_mosaic.version = 11 : i64} {
  func.func @kernel(%arg0: memref<16x2xf32, #tpu.memory_space<vmem>>, %arg1: memref<1x16xf32, #tpu.memory_space<vmem>>, %arg2: memref<8x50xf32, #tpu.memory_space<vmem>>, %arg3: memref<2x32xf32, #tpu.memory_space<vmem>>, %arg4: memref<50x128xf32, #tpu.memory_space<vmem>>, %arg5: memref<512x32xf32, #tpu.memory_space<vmem>>, %arg6: memref<32x1024xf32, #tpu.memory_space<vmem>>, %arg7: memref<8x512xf32, #tpu.memory_space<vmem>>, %arg8: memref<16x512xf32, #tpu.memory_space<vmem>>, %arg9: memref<8x128xf32, #tpu.memory_space<vmem>>) attributes {dimension_semantics = [], scalar_prefetch = 0 : i64, scratch_operands = 0 : i64, tpu.core_type = #tpu.core_type<tc>} {
    %c0 = arith.constant 0 : index
    %c0_0 = arith.constant 0 : index
    %0 = vector.load %arg7[%c0, %c0_0] : memref<8x512xf32, #tpu.memory_space<vmem>>, vector<1x32xf32>
    %c1 = arith.constant 1 : index
    %c0_1 = arith.constant 0 : index
    %1 = vector.load %arg7[%c1, %c0_1] : memref<8x512xf32, #tpu.memory_space<vmem>>, vector<1x32xf32>
    %c2 = arith.constant 2 : index
    %c0_2 = arith.constant 0 : index
    %2 = vector.load %arg7[%c2, %c0_2] : memref<8x512xf32, #tpu.memory_space<vmem>>, vector<1x32xf32>
    %c3 = arith.constant 3 : index
    %c0_3 = arith.constant 0 : index
    %3 = vector.load %arg7[%c3, %c0_3] : memref<8x512xf32, #tpu.memory_space<vmem>>, vector<1x512xf32>
    %c4 = arith.constant 4 : index
    %c0_4 = arith.constant 0 : index
    %4 = vector.load %arg7[%c4, %c0_4] : memref<8x512xf32, #tpu.memory_space<vmem>>, vector<1x128xf32>
    %c5 = arith.constant 5 : index
    %c0_5 = arith.constant 0 : index
    %5 = vector.load %arg7[%c5, %c0_5] : memref<8x512xf32, #tpu.memory_space<vmem>>, vector<1x128xf32>
    %c0_6 = arith.constant 0 : index
    %c0_7 = arith.constant 0 : index
    %6 = vector.load %arg6[%c0_6, %c0_7] : memref<32x1024xf32, #tpu.memory_space<vmem>>, vector<32x32xf32>
    %c0_8 = arith.constant 0 : index
    %c128 = arith.constant 128 : index
    %7 = vector.load %arg6[%c0_8, %c128] : memref<32x1024xf32, #tpu.memory_space<vmem>>, vector<32x128xf32>
    %c0_9 = arith.constant 0 : index
    %c256 = arith.constant 256 : index
    %8 = vector.load %arg6[%c0_9, %c256] : memref<32x1024xf32, #tpu.memory_space<vmem>>, vector<32x128xf32>
    %c0_10 = arith.constant 0 : index
    %c384 = arith.constant 384 : index
    %9 = vector.load %arg6[%c0_10, %c384] : memref<32x1024xf32, #tpu.memory_space<vmem>>, vector<32x128xf32>
    %c0_11 = arith.constant 0 : index
    %c512 = arith.constant 512 : index
    %10 = vector.load %arg6[%c0_11, %c512] : memref<32x1024xf32, #tpu.memory_space<vmem>>, vector<32x512xf32>
    %c0_12 = arith.constant 0 : index
    %c0_13 = arith.constant 0 : index
    %11 = vector.load %arg0[%c0_12, %c0_13] : memref<16x2xf32, #tpu.memory_space<vmem>>, vector<16x2xf32>
    %c0_14 = arith.constant 0 : index
    %c0_15 = arith.constant 0 : index
    %12 = vector.load %arg3[%c0_14, %c0_15] : memref<2x32xf32, #tpu.memory_space<vmem>>, vector<2x32xf32>
    %cst = arith.constant dense<0.000000e+00> : vector<16x32xf32>
    %13 = tpu.matmul %11, %12, %cst {dimension_numbers = #tpu.dot_dimension_numbers<[1], [0], [0], [1], [0, 0, 1, 1], [], []>} : vector<16x2xf32>, vector<2x32xf32>, vector<16x32xf32> -> vector<16x32xf32>
    %14 = vector.broadcast %0 : vector<1x32xf32> to vector<16x32xf32>
    %15 = arith.addf %13, %14 : vector<16x32xf32>
    %cst_16 = arith.constant 0.000000e+00 : f32
    %16 = vector.broadcast %cst_16 : f32 to vector<16x32xf32>
    %17 = arith.maximumf %15, %16 : vector<16x32xf32>
    %cst_17 = arith.constant dense<0.000000e+00> : vector<16x32xf32>
    %18 = tpu.matmul %17, %6, %cst_17 {dimension_numbers = #tpu.dot_dimension_numbers<[1], [0], [0], [1], [0, 0, 1, 1], [], []>} : vector<16x32xf32>, vector<32x32xf32>, vector<16x32xf32> -> vector<16x32xf32>
    %19 = vector.broadcast %1 : vector<1x32xf32> to vector<16x32xf32>
    %20 = arith.addf %18, %19 : vector<16x32xf32>
    %cst_18 = arith.constant 0.000000e+00 : f32
    %21 = vector.broadcast %cst_18 : f32 to vector<16x32xf32>
    %22 = arith.maximumf %20, %21 : vector<16x32xf32>
    %cst_19 = arith.constant dense<0.000000e+00> : vector<16x512xf32>
    %23 = tpu.matmul %22, %10, %cst_19 {dimension_numbers = #tpu.dot_dimension_numbers<[1], [0], [0], [1], [0, 0, 1, 1], [], []>} : vector<16x32xf32>, vector<32x512xf32>, vector<16x512xf32> -> vector<16x512xf32>
    %24 = vector.broadcast %3 : vector<1x512xf32> to vector<16x512xf32>
    %25 = arith.addf %23, %24 : vector<16x512xf32>
    %c0_20 = arith.constant 0 : index
    %c0_21 = arith.constant 0 : index
    %26 = vector.load %arg8[%c0_20, %c0_21] : memref<16x512xf32, #tpu.memory_space<vmem>>, vector<16x512xf32>
    tpu.vector_store %arg8[%c0_20, %c0_21], %25 {strides = array<i32>} : memref<16x512xf32, #tpu.memory_space<vmem>>, vector<16x512xf32>,
    %c0_22 = arith.constant 0 : index
    %c0_23 = arith.constant 0 : index
    %27 = vector.load %arg1[%c0_22, %c0_23] : memref<1x16xf32, #tpu.memory_space<vmem>>, vector<1x16xf32>
    %cst_24 = arith.constant dense<0.000000e+00> : vector<1x512xf32>
    %28 = tpu.matmul %27, %25, %cst_24 {dimension_numbers = #tpu.dot_dimension_numbers<[1], [0], [0], [1], [0, 0, 1, 1], [], []>} : vector<1x16xf32>, vector<16x512xf32>, vector<1x512xf32> -> vector<1x512xf32>
    %c0_25 = arith.constant 0 : index
    %c0_26 = arith.constant 0 : index
    %29 = vector.load %arg5[%c0_25, %c0_26] : memref<512x32xf32, #tpu.memory_space<vmem>>, vector<512x32xf32>
    %cst_27 = arith.constant dense<0.000000e+00> : vector<1x32xf32>
    %30 = tpu.matmul %28, %29, %cst_27 {dimension_numbers = #tpu.dot_dimension_numbers<[1], [0], [0], [1], [0, 0, 1, 1], [], []>} : vector<1x512xf32>, vector<512x32xf32>, vector<1x32xf32> -> vector<1x32xf32>
    %31 = arith.addf %30, %2 : vector<1x32xf32>
    %cst_28 = arith.constant dense<0.000000e+00> : vector<1x128xf32>
    %32 = tpu.matmul %31, %7, %cst_28 {dimension_numbers = #tpu.dot_dimension_numbers<[1], [0], [0], [1], [0, 0, 1, 1], [], []>} : vector<1x32xf32>, vector<32x128xf32>, vector<1x128xf32> -> vector<1x128xf32>
    %33 = arith.addf %32, %5 : vector<1x128xf32>
    %c0_29 = arith.constant 0 : index
    %c0_30 = arith.constant 0 : index
    %34 = vector.load %arg2[%c0_29, %c0_30] : memref<8x50xf32, #tpu.memory_space<vmem>>, vector<8x50xf32>
    %c0_31 = arith.constant 0 : index
    %c0_32 = arith.constant 0 : index
    %35 = vector.load %arg4[%c0_31, %c0_32] : memref<50x128xf32, #tpu.memory_space<vmem>>, vector<50x128xf32>
    %cst_33 = arith.constant dense<0.000000e+00> : vector<8x128xf32>
    %36 = tpu.matmul %34, %35, %cst_33 {dimension_numbers = #tpu.dot_dimension_numbers<[1], [0], [0], [1], [0, 0, 1, 1], [], []>} : vector<8x50xf32>, vector<50x128xf32>, vector<8x128xf32> -> vector<8x128xf32>
    %37 = vector.broadcast %33 : vector<1x128xf32> to vector<8x128xf32>
    %38 = arith.addf %36, %37 : vector<8x128xf32>
    %cst_34 = arith.constant 0.000000e+00 : f32
    %39 = vector.broadcast %cst_34 : f32 to vector<1x32xf32>
    %cst_35 = arith.constant 0.000000e+00 : f32
    %40 = vector.broadcast %cst_35 : f32 to vector<1x32xf32>
    %41 = vector.extract_strided_slice %38 {offsets = [0, 0], sizes = [1, 128], strides = [1, 1]} : vector<8x128xf32> to vector<1x128xf32>
    %cst_36 = arith.constant dense<0.000000e+00> : vector<1x128xf32>
    %42 = tpu.matmul %39, %8, %cst_36 {dimension_numbers = #tpu.dot_dimension_numbers<[1], [0], [0], [1], [0, 0, 1, 1], [], []>} : vector<1x32xf32>, vector<32x128xf32>, vector<1x128xf32> -> vector<1x128xf32>
    %43 = arith.addf %41, %42 : vector<1x128xf32>
    %44 = arith.negf %43 : vector<1x128xf32>
    %45 = math.exp %44 : vector<1x128xf32>
    %cst_37 = arith.constant 1.000000e+00 : f32
    %46 = vector.broadcast %cst_37 : f32 to vector<1x128xf32>
    %47 = arith.addf %46, %45 : vector<1x128xf32>
    %48 = arith.divf %46, %47 : vector<1x128xf32>
    %49 = math.tanh %43 : vector<1x128xf32>
    %50 = vector.extract_strided_slice %48 {offsets = [0, 0], sizes = [1, 32], strides = [1, 1]} : vector<1x128xf32> to vector<1x32xf32>
    %51 = vector.extract_strided_slice %48 {offsets = [0, 32], sizes = [1, 32], strides = [1, 1]} : vector<1x128xf32> to vector<1x32xf32>
    %52 = vector.extract_strided_slice %49 {offsets = [0, 64], sizes = [1, 32], strides = [1, 1]} : vector<1x128xf32> to vector<1x32xf32>
    %53 = vector.extract_strided_slice %48 {offsets = [0, 96], sizes = [1, 32], strides = [1, 1]} : vector<1x128xf32> to vector<1x32xf32>
    %54 = arith.mulf %51, %40 : vector<1x32xf32>
    %55 = arith.mulf %50, %52 : vector<1x32xf32>
    %56 = arith.addf %54, %55 : vector<1x32xf32>
    %57 = math.tanh %56 : vector<1x32xf32>
    %58 = arith.mulf %53, %57 : vector<1x32xf32>
    %59 = vector.extract_strided_slice %38 {offsets = [1, 0], sizes = [1, 128], strides = [1, 1]} : vector<8x128xf32> to vector<1x128xf32>
    %cst_38 = arith.constant dense<0.000000e+00> : vector<1x128xf32>
    %60 = tpu.matmul %58, %8, %cst_38 {dimension_numbers = #tpu.dot_dimension_numbers<[1], [0], [0], [1], [0, 0, 1, 1], [], []>} : vector<1x32xf32>, vector<32x128xf32>, vector<1x128xf32> -> vector<1x128xf32>
    %61 = arith.addf %59, %60 : vector<1x128xf32>
    %62 = arith.negf %61 : vector<1x128xf32>
    %63 = math.exp %62 : vector<1x128xf32>
    %cst_39 = arith.constant 1.000000e+00 : f32
    %64 = vector.broadcast %cst_39 : f32 to vector<1x128xf32>
    %65 = arith.addf %64, %63 : vector<1x128xf32>
    %66 = arith.divf %64, %65 : vector<1x128xf32>
    %67 = math.tanh %61 : vector<1x128xf32>
    %68 = vector.extract_strided_slice %66 {offsets = [0, 0], sizes = [1, 32], strides = [1, 1]} : vector<1x128xf32> to vector<1x32xf32>
    %69 = vector.extract_strided_slice %66 {offsets = [0, 32], sizes = [1, 32], strides = [1, 1]} : vector<1x128xf32> to vector<1x32xf32>
    %70 = vector.extract_strided_slice %67 {offsets = [0, 64], sizes = [1, 32], strides = [1, 1]} : vector<1x128xf32> to vector<1x32xf32>
    %71 = vector.extract_strided_slice %66 {offsets = [0, 96], sizes = [1, 32], strides = [1, 1]} : vector<1x128xf32> to vector<1x32xf32>
    %72 = arith.mulf %69, %56 : vector<1x32xf32>
    %73 = arith.mulf %68, %70 : vector<1x32xf32>
    %74 = arith.addf %72, %73 : vector<1x32xf32>
    %75 = math.tanh %74 : vector<1x32xf32>
    %76 = arith.mulf %71, %75 : vector<1x32xf32>
    %77 = vector.extract_strided_slice %38 {offsets = [2, 0], sizes = [1, 128], strides = [1, 1]} : vector<8x128xf32> to vector<1x128xf32>
    %cst_40 = arith.constant dense<0.000000e+00> : vector<1x128xf32>
    %78 = tpu.matmul %76, %8, %cst_40 {dimension_numbers = #tpu.dot_dimension_numbers<[1], [0], [0], [1], [0, 0, 1, 1], [], []>} : vector<1x32xf32>, vector<32x128xf32>, vector<1x128xf32> -> vector<1x128xf32>
    %79 = arith.addf %77, %78 : vector<1x128xf32>
    %80 = arith.negf %79 : vector<1x128xf32>
    %81 = math.exp %80 : vector<1x128xf32>
    %cst_41 = arith.constant 1.000000e+00 : f32
    %82 = vector.broadcast %cst_41 : f32 to vector<1x128xf32>
    %83 = arith.addf %82, %81 : vector<1x128xf32>
    %84 = arith.divf %82, %83 : vector<1x128xf32>
    %85 = math.tanh %79 : vector<1x128xf32>
    %86 = vector.extract_strided_slice %84 {offsets = [0, 0], sizes = [1, 32], strides = [1, 1]} : vector<1x128xf32> to vector<1x32xf32>
    %87 = vector.extract_strided_slice %84 {offsets = [0, 32], sizes = [1, 32], strides = [1, 1]} : vector<1x128xf32> to vector<1x32xf32>
    %88 = vector.extract_strided_slice %85 {offsets = [0, 64], sizes = [1, 32], strides = [1, 1]} : vector<1x128xf32> to vector<1x32xf32>
    %89 = vector.extract_strided_slice %84 {offsets = [0, 96], sizes = [1, 32], strides = [1, 1]} : vector<1x128xf32> to vector<1x32xf32>
    %90 = arith.mulf %87, %74 : vector<1x32xf32>
    %91 = arith.mulf %86, %88 : vector<1x32xf32>
    %92 = arith.addf %90, %91 : vector<1x32xf32>
    %93 = math.tanh %92 : vector<1x32xf32>
    %94 = arith.mulf %89, %93 : vector<1x32xf32>
    %95 = vector.extract_strided_slice %38 {offsets = [3, 0], sizes = [1, 128], strides = [1, 1]} : vector<8x128xf32> to vector<1x128xf32>
    %cst_42 = arith.constant dense<0.000000e+00> : vector<1x128xf32>
    %96 = tpu.matmul %94, %8, %cst_42 {dimension_numbers = #tpu.dot_dimension_numbers<[1], [0], [0], [1], [0, 0, 1, 1], [], []>} : vector<1x32xf32>, vector<32x128xf32>, vector<1x128xf32> -> vector<1x128xf32>
    %97 = arith.addf %95, %96 : vector<1x128xf32>
    %98 = arith.negf %97 : vector<1x128xf32>
    %99 = math.exp %98 : vector<1x128xf32>
    %cst_43 = arith.constant 1.000000e+00 : f32
    %100 = vector.broadcast %cst_43 : f32 to vector<1x128xf32>
    %101 = arith.addf %100, %99 : vector<1x128xf32>
    %102 = arith.divf %100, %101 : vector<1x128xf32>
    %103 = math.tanh %97 : vector<1x128xf32>
    %104 = vector.extract_strided_slice %102 {offsets = [0, 0], sizes = [1, 32], strides = [1, 1]} : vector<1x128xf32> to vector<1x32xf32>
    %105 = vector.extract_strided_slice %102 {offsets = [0, 32], sizes = [1, 32], strides = [1, 1]} : vector<1x128xf32> to vector<1x32xf32>
    %106 = vector.extract_strided_slice %103 {offsets = [0, 64], sizes = [1, 32], strides = [1, 1]} : vector<1x128xf32> to vector<1x32xf32>
    %107 = vector.extract_strided_slice %102 {offsets = [0, 96], sizes = [1, 32], strides = [1, 1]} : vector<1x128xf32> to vector<1x32xf32>
    %108 = arith.mulf %105, %92 : vector<1x32xf32>
    %109 = arith.mulf %104, %106 : vector<1x32xf32>
    %110 = arith.addf %108, %109 : vector<1x32xf32>
    %111 = math.tanh %110 : vector<1x32xf32>
    %112 = arith.mulf %107, %111 : vector<1x32xf32>
    %113 = vector.extract_strided_slice %38 {offsets = [4, 0], sizes = [1, 128], strides = [1, 1]} : vector<8x128xf32> to vector<1x128xf32>
    %cst_44 = arith.constant dense<0.000000e+00> : vector<1x128xf32>
    %114 = tpu.matmul %112, %8, %cst_44 {dimension_numbers = #tpu.dot_dimension_numbers<[1], [0], [0], [1], [0, 0, 1, 1], [], []>} : vector<1x32xf32>, vector<32x128xf32>, vector<1x128xf32> -> vector<1x128xf32>
    %115 = arith.addf %113, %114 : vector<1x128xf32>
    %116 = arith.negf %115 : vector<1x128xf32>
    %117 = math.exp %116 : vector<1x128xf32>
    %cst_45 = arith.constant 1.000000e+00 : f32
    %118 = vector.broadcast %cst_45 : f32 to vector<1x128xf32>
    %119 = arith.addf %118, %117 : vector<1x128xf32>
    %120 = arith.divf %118, %119 : vector<1x128xf32>
    %121 = math.tanh %115 : vector<1x128xf32>
    %122 = vector.extract_strided_slice %120 {offsets = [0, 0], sizes = [1, 32], strides = [1, 1]} : vector<1x128xf32> to vector<1x32xf32>
    %123 = vector.extract_strided_slice %120 {offsets = [0, 32], sizes = [1, 32], strides = [1, 1]} : vector<1x128xf32> to vector<1x32xf32>
    %124 = vector.extract_strided_slice %121 {offsets = [0, 64], sizes = [1, 32], strides = [1, 1]} : vector<1x128xf32> to vector<1x32xf32>
    %125 = vector.extract_strided_slice %120 {offsets = [0, 96], sizes = [1, 32], strides = [1, 1]} : vector<1x128xf32> to vector<1x32xf32>
    %126 = arith.mulf %123, %110 : vector<1x32xf32>
    %127 = arith.mulf %122, %124 : vector<1x32xf32>
    %128 = arith.addf %126, %127 : vector<1x32xf32>
    %129 = math.tanh %128 : vector<1x32xf32>
    %130 = arith.mulf %125, %129 : vector<1x32xf32>
    %131 = vector.extract_strided_slice %38 {offsets = [5, 0], sizes = [1, 128], strides = [1, 1]} : vector<8x128xf32> to vector<1x128xf32>
    %cst_46 = arith.constant dense<0.000000e+00> : vector<1x128xf32>
    %132 = tpu.matmul %130, %8, %cst_46 {dimension_numbers = #tpu.dot_dimension_numbers<[1], [0], [0], [1], [0, 0, 1, 1], [], []>} : vector<1x32xf32>, vector<32x128xf32>, vector<1x128xf32> -> vector<1x128xf32>
    %133 = arith.addf %131, %132 : vector<1x128xf32>
    %134 = arith.negf %133 : vector<1x128xf32>
    %135 = math.exp %134 : vector<1x128xf32>
    %cst_47 = arith.constant 1.000000e+00 : f32
    %136 = vector.broadcast %cst_47 : f32 to vector<1x128xf32>
    %137 = arith.addf %136, %135 : vector<1x128xf32>
    %138 = arith.divf %136, %137 : vector<1x128xf32>
    %139 = math.tanh %133 : vector<1x128xf32>
    %140 = vector.extract_strided_slice %138 {offsets = [0, 0], sizes = [1, 32], strides = [1, 1]} : vector<1x128xf32> to vector<1x32xf32>
    %141 = vector.extract_strided_slice %138 {offsets = [0, 32], sizes = [1, 32], strides = [1, 1]} : vector<1x128xf32> to vector<1x32xf32>
    %142 = vector.extract_strided_slice %139 {offsets = [0, 64], sizes = [1, 32], strides = [1, 1]} : vector<1x128xf32> to vector<1x32xf32>
    %143 = vector.extract_strided_slice %138 {offsets = [0, 96], sizes = [1, 32], strides = [1, 1]} : vector<1x128xf32> to vector<1x32xf32>
    %144 = arith.mulf %141, %128 : vector<1x32xf32>
    %145 = arith.mulf %140, %142 : vector<1x32xf32>
    %146 = arith.addf %144, %145 : vector<1x32xf32>
    %147 = math.tanh %146 : vector<1x32xf32>
    %148 = arith.mulf %143, %147 : vector<1x32xf32>
    %149 = vector.extract_strided_slice %38 {offsets = [6, 0], sizes = [1, 128], strides = [1, 1]} : vector<8x128xf32> to vector<1x128xf32>
    %cst_48 = arith.constant dense<0.000000e+00> : vector<1x128xf32>
    %150 = tpu.matmul %148, %8, %cst_48 {dimension_numbers = #tpu.dot_dimension_numbers<[1], [0], [0], [1], [0, 0, 1, 1], [], []>} : vector<1x32xf32>, vector<32x128xf32>, vector<1x128xf32> -> vector<1x128xf32>
    %151 = arith.addf %149, %150 : vector<1x128xf32>
    %152 = arith.negf %151 : vector<1x128xf32>
    %153 = math.exp %152 : vector<1x128xf32>
    %cst_49 = arith.constant 1.000000e+00 : f32
    %154 = vector.broadcast %cst_49 : f32 to vector<1x128xf32>
    %155 = arith.addf %154, %153 : vector<1x128xf32>
    %156 = arith.divf %154, %155 : vector<1x128xf32>
    %157 = math.tanh %151 : vector<1x128xf32>
    %158 = vector.extract_strided_slice %156 {offsets = [0, 0], sizes = [1, 32], strides = [1, 1]} : vector<1x128xf32> to vector<1x32xf32>
    %159 = vector.extract_strided_slice %156 {offsets = [0, 32], sizes = [1, 32], strides = [1, 1]} : vector<1x128xf32> to vector<1x32xf32>
    %160 = vector.extract_strided_slice %157 {offsets = [0, 64], sizes = [1, 32], strides = [1, 1]} : vector<1x128xf32> to vector<1x32xf32>
    %161 = vector.extract_strided_slice %156 {offsets = [0, 96], sizes = [1, 32], strides = [1, 1]} : vector<1x128xf32> to vector<1x32xf32>
    %162 = arith.mulf %159, %146 : vector<1x32xf32>
    %163 = arith.mulf %158, %160 : vector<1x32xf32>
    %164 = arith.addf %162, %163 : vector<1x32xf32>
    %165 = math.tanh %164 : vector<1x32xf32>
    %166 = arith.mulf %161, %165 : vector<1x32xf32>
    %167 = vector.extract_strided_slice %38 {offsets = [7, 0], sizes = [1, 128], strides = [1, 1]} : vector<8x128xf32> to vector<1x128xf32>
    %cst_50 = arith.constant dense<0.000000e+00> : vector<1x128xf32>
    %168 = tpu.matmul %166, %8, %cst_50 {dimension_numbers = #tpu.dot_dimension_numbers<[1], [0], [0], [1], [0, 0, 1, 1], [], []>} : vector<1x32xf32>, vector<32x128xf32>, vector<1x128xf32> -> vector<1x128xf32>
    %169 = arith.addf %167, %168 : vector<1x128xf32>
    %170 = arith.negf %169 : vector<1x128xf32>
    %171 = math.exp %170 : vector<1x128xf32>
    %cst_51 = arith.constant 1.000000e+00 : f32
    %172 = vector.broadcast %cst_51 : f32 to vector<1x128xf32>
    %173 = arith.addf %172, %171 : vector<1x128xf32>
    %174 = arith.divf %172, %173 : vector<1x128xf32>
    %175 = math.tanh %169 : vector<1x128xf32>
    %176 = vector.extract_strided_slice %174 {offsets = [0, 0], sizes = [1, 32], strides = [1, 1]} : vector<1x128xf32> to vector<1x32xf32>
    %177 = vector.extract_strided_slice %174 {offsets = [0, 32], sizes = [1, 32], strides = [1, 1]} : vector<1x128xf32> to vector<1x32xf32>
    %178 = vector.extract_strided_slice %175 {offsets = [0, 64], sizes = [1, 32], strides = [1, 1]} : vector<1x128xf32> to vector<1x32xf32>
    %179 = vector.extract_strided_slice %174 {offsets = [0, 96], sizes = [1, 32], strides = [1, 1]} : vector<1x128xf32> to vector<1x32xf32>
    %180 = arith.mulf %177, %164 : vector<1x32xf32>
    %181 = arith.mulf %176, %178 : vector<1x32xf32>
    %182 = arith.addf %180, %181 : vector<1x32xf32>
    %183 = math.tanh %182 : vector<1x32xf32>
    %184 = arith.mulf %179, %183 : vector<1x32xf32>
    %185 = tpu.concatenate %58, %76, %94, %112, %130, %148, %166, %184 in 0 : vector<1x32xf32>, vector<1x32xf32>, vector<1x32xf32>, vector<1x32xf32>, vector<1x32xf32>, vector<1x32xf32>, vector<1x32xf32>, vector<1x32xf32> -> vector<8x32xf32>
    %cst_52 = arith.constant dense<0.000000e+00> : vector<8x128xf32>
    %186 = tpu.matmul %185, %9, %cst_52 {dimension_numbers = #tpu.dot_dimension_numbers<[1], [0], [0], [1], [0, 0, 1, 1], [], []>} : vector<8x32xf32>, vector<32x128xf32>, vector<8x128xf32> -> vector<8x128xf32>
    %187 = vector.broadcast %4 : vector<1x128xf32> to vector<8x128xf32>
    %188 = arith.addf %186, %187 : vector<8x128xf32>
    %c0_53 = arith.constant 0 : index
    %c0_54 = arith.constant 0 : index
    %189 = vector.load %arg9[%c0_53, %c0_54] : memref<8x128xf32, #tpu.memory_space<vmem>>, vector<8x128xf32>
    tpu.vector_store %arg9[%c0_53, %c0_54], %188 {strides = array<i32>} : memref<8x128xf32, #tpu.memory_space<vmem>>, vector<8x128xf32>,
    return
  }
}

</mosaic_0001>

<bundles_post_ra>
// kernel: simple_forward.1
= control target key start
LH: loop header
LB: loop body
LE: loop exit
PB: predicated region body
PF: predicated region fallthrough
CT: control target
= control target key end

     0   :  { %vm81_vm0 = vcmask 1041408   ;;  %vm74_vm1 = vcmask 15360   ;;  %s3055_s0 = inlined_call_operand.vmem [shape: f32[16,2], index: 0, kind: input, shape index: {}]   ;;  %s3056_s1 = inlined_call_operand.vmem [shape: f32[1,16], index: 1, kind: input, shape index: {}]   ;;  %s3057_s2 = inlined_call_operand.vmem [shape: f32[8,50], index: 2, kind: input, shape index: {}]   ;;  %s3058_s3 = inlined_call_operand.vmem [shape: f32[2,32], index: 3, kind: input, shape index: {}]   ;;  %s3059_s4 = inlined_call_operand.vmem [shape: f32[50,128], index: 4, kind: input, shape index: {}]   ;;  %s3060_s5 = inlined_call_operand.vmem [shape: f32[512,32], index: 5, kind: input, shape index: {}]   ;;  %s3061_s6 = inlined_call_operand.vmem [shape: f32[32,1024], index: 6, kind: input, shape index: {}]   ;;  %s3062_s7 = inlined_call_operand.vmem [shape: f32[8,512], index: 7, kind: input, shape index: {}]   ;;  %s3063_s8 = inlined_call_operand.vmem [shape: f32[16,512], index: 8, kind: output, shape index: {0}]   ;;  %s3064_s9 = inlined_call_operand.hbm [shape: f32[8,128], index: 9, kind: output, shape index: {1}]  }
   0x1   :  { %v73_v0 = vld [vmem:[%s3058_s3] sm:$0x3]  ;;  %v72_v2 = vld [vmem:[%s3055_s0 + $0x8] sm:$0xff] }
   0x2   :  { %v71_v1 = vld [vmem:[%s3055_s0] sm:$0xff]  ;;  %2069 = vmatprep.subr.msk.mxu1 %vm81_vm0, %v73_v0 }
   0x3   :  { %2071 = vmatprep.mubr.msk.f32.mxu1 %vm74_vm1, %v71_v1  ;;  %v39_v3 = vld [vmem:[%s3061_s6] sm:$0xff] }
   0x4   :  { %v40_v4 = vld [vmem:[%s3061_s6 + $0x40] sm:$0xff] }
   0x5   :  { %15 = vsyncpa [#allocation3], 0  ;;  %2070 = vmatpush3.msk.msra.mxu1 %vm81_vm0, %v73_v0  ;;  %v2212_v5 = vpack.c.bf16 %v40_v4, %v39_v3  ;;  %v41_v6 = vld [vmem:[%s3061_s6 + $0x80] sm:$0xff]  ;;  %v56_v9 = vld [vmem:[%s3061_s6 + $0x28] sm:$0xff]  ;;  %vm162_vm2 = vcmask 261120   ;;  %v2471_v40 = vmov 0.0  }
   0x6   :  { %2072 = vmatmul.mubr.msk.f32.vlgmr.msra.gmra.mrb[0].mxu1 %vm74_vm1, %v72_v2  ;;  %v42_v7 = vld [vmem:[%s3061_s6 + $0xc0] sm:$0xff]  ;;  %v60_v10 = vld [vmem:[%s3061_s6 + $0x68] sm:$0xff]  ;;  %v58_v11 = vld [vmem:[%s3061_s6 + $0x38] sm:$0xff]  ;;  %337 = vmatprep.mubr.f32.mxu0 %v2471_v40  ;;  %vm436_vm3 = vcmask 130048   ;;  %vm2473_vm4 = vmmov 0   ;;  %vm871_vm5 = vcmask 408576  }
   0x7   :  { %2213 = vmatprep.subr.bf16.mxu1 %v2212_v5  ;;  %v2216_v8 = vpack.c.bf16 %v42_v7, %v41_v6  ;;  %v2220_v12 = vpack.c.bf16 %v60_v10, %v56_v9  ;;  %v62_v13 = vld [vmem:[%s3061_s6 + $0x78] sm:$0xff]  ;;  %v55_v14 = vld [vmem:[%s3061_s6 + $0x20] sm:$0xff]  ;;  %v57_v22 = vld [vmem:[%s3061_s6 + $0x30] sm:$0xff]  ;;  %s2474_s22 = smov 64   ;;  %s2475_s23 = smov 32   ;;  %vm1794_vm6 = vcmask 1040384  }
   0x8   :  { %2215 = vmatpush3.bf16.msra.mxu1 %v2212_v5  ;;  %v59_v15 = vld [vmem:[%s3061_s6 + $0x60] sm:$0xff]  ;;  %v2228_v16 = vpack.c.bf16 %v62_v13, %v58_v11  ;;  %v61_v23 = vld [vmem:[%s3061_s6 + $0x70] sm:$0xff]  ;;  %v64_v28 = vld [vmem:[%s3061_s6 + $0xa8] sm:$0xff]  ;;  %vm1797_vm7 = vcmask 1042432   ;;  %vm1799_vm8 = vcmask 1043456   ;;  %vm1801_vm9 = vcmask 1044480  }
   0x9   :  { %2217 = vmatprep.subr.bf16.mxu1 %v2216_v8  ;;  %v2222_v17 = vpack.c.bf16 %v59_v15, %v55_v14  ;;  %2221 = vmatprep.subr.bf16.mxu0 %v2220_v12  ;;  %v32_v18 = vld [vmem:[%s3062_s7] ss:$0 sm:$0xff]  ;;  %v2230_v26 = vpack.c.bf16 %v61_v23, %v57_v22  ;;  %v68_v29 = vld [vmem:[%s3061_s6 + $0xe8] sm:$0xff]  ;;  %v66_v30 = vld [vmem:[%s3061_s6 + $0xb8] sm:$0xff]  ;;  %vm1803_vm10 = vcmask 1045504   ;;  %vm1805_vm11 = vcmask 1046528  }
   0xa   :  { %v2224_v31 = vpack.c.bf16 %v68_v29, %v64_v28  ;;  %v70_v32 = vld [vmem:[%s3061_s6 + $0xf8] sm:$0xff]  ;;  %v63_v33 = vld [vmem:[%s3061_s6 + $0xa0] sm:$0xff]  ;;  %v65_v36 = vld [vmem:[%s3061_s6 + $0xb0] sm:$0xff]  ;;  %v247_v29 = vlaneseq }
   0xb   :  { %2223 = vmatpush1.bf16.msra.mxu0 %v2222_v17  ;;  %v2232_v34 = vpack.c.bf16 %v70_v32, %v66_v30  ;;  %v67_v35 = vld [vmem:[%s3061_s6 + $0xe0] sm:$0xff]  ;;  %v69_v37 = vld [vmem:[%s3061_s6 + $0xf0] sm:$0xff]  ;;  %v599_v49 = vld [vmem:[%s3060_s5 + $0x88] sm:$0xff] }
   0xc   :  { %2219 = vmatpush3.bf16.msra.mxu1 %v2216_v8  ;;  %2225 = vmatprep.subr.bf16.mxu0 %v2224_v31  ;;  %v2226_v38 = vpack.c.bf16 %v67_v35, %v63_v33  ;;  %v2234_v39 = vpack.c.bf16 %v69_v37, %v65_v36  ;;  %v33_v41 = vld [vmem:[%s3062_s7 + $0x1] ss:$0 sm:$0xff]  ;;  %v583_v52 = vld [vmem:[%s3060_s5 + $0x8] sm:$0xff]  ;;  %v600_v54 = vld [vmem:[%s3060_s5 + $0x90] sm:$0xff]  ;;  %v2705_v30 = vshrl.u32 %v247_v29, 7 }
   0xd   :  { %2229 = vmatprep.subr.bf16.mxu1 %v2228_v16  ;;  %v598_v48 = vld [vmem:[%s3060_s5 + $0x80] sm:$0xff]  ;;  %v601_v55 = vld [vmem:[%s3060_s5 + $0x98] sm:$0xff]  ;;  %v584_v56 = vld [vmem:[%s3060_s5 + $0x10] sm:$0xff] }
   0xe   :  { %v582_v50 = vld [vmem:[%s3060_s5] sm:$0xff]  ;;  %v2244_v51 = vpack.c.bf16 %v599_v49, %v598_v48  ;;  %v585_v57 = vld [vmem:[%s3060_s5 + $0x18] sm:$0xff]  ;;  %v2248_v58 = vpack.c.bf16 %v601_v55, %v600_v54  ;;  %v603_v61 = vld [vmem:[%s3060_s5 + $0xa8] sm:$0xff]  ;;  %v249_v31 = vsub.s32 0, %v2705_v30  ;;  %v257_v32 = vsub.s32 2, %v2705_v30 }
   0xf   :  { %2227 = vmatpush1.bf16.msra.mxu0 %v2226_v38  ;;  %v2246_v53 = vpack.c.bf16 %v583_v52, %v582_v50  ;;  %v2250_v59 = vpack.c.bf16 %v585_v57, %v584_v56  ;;  %v602_v60 = vld [vmem:[%s3060_s5 + $0xa0] sm:$0xff]  ;;  %v587_v0 = vld [vmem:[%s3060_s5 + $0x28] sm:$0xff]  ;;  %v604_v2 = vld [vmem:[%s3060_s5 + $0xb0] sm:$0xff]  ;;  %v261_v35 = vsub.s32 3, %v2705_v30 }
  0x10   :  { %v2252_v62 = vpack.c.bf16 %v603_v61, %v602_v60  ;;  %v586_v63 = vld [vmem:[%s3060_s5 + $0x20] sm:$0xff]  ;;  %v605_v3 = vld [vmem:[%s3060_s5 + $0xb8] sm:$0xff]  ;;  %v588_v4 = vld [vmem:[%s3060_s5 + $0x30] sm:$0xff] }
  0x11   :  { %v2254_v1 = vpack.c.bf16 %v587_v0, %v586_v63  ;;  %v2256_v5 = vpack.c.bf16 %v605_v3, %v604_v2  ;;  %v589_v6 = vld [vmem:[%s3060_s5 + $0x38] sm:$0xff]  ;;  %v606_v8 = vld [vmem:[%s3060_s5 + $0xc0] sm:$0xff]  ;;  %v607_v9 = vld [vmem:[%s3060_s5 + $0xc8] sm:$0xff] }
  0x12   :  { %v2258_v7 = vpack.c.bf16 %v589_v6, %v588_v4  ;;  %v590_v10 = vld [vmem:[%s3060_s5 + $0x40] sm:$0xff]  ;;  %v2260_v11 = vpack.c.bf16 %v607_v9, %v606_v8  ;;  %v591_v12 = vld [vmem:[%s3060_s5 + $0x48] sm:$0xff]  ;;  %v608_v14 = vld [vmem:[%s3060_s5 + $0xd0] sm:$0xff] }
  0x13   :  { %v2262_v13 = vpack.c.bf16 %v591_v12, %v590_v10  ;;  %v609_v15 = vld [vmem:[%s3060_s5 + $0xd8] sm:$0xff]  ;;  %v592_v16 = vld [vmem:[%s3060_s5 + $0x50] sm:$0xff]  ;;  %v594_v22 = vld [vmem:[%s3060_s5 + $0x60] sm:$0xff] }
  0x14   :  { %v2264_v17 = vpack.c.bf16 %v609_v15, %v608_v14  ;;  %v1901_v33 = vld [vmem:[%s3062_s7 + $0x3] ss:$8 sm:$0xf]  ;;  %v435_v63 = vld [vmem:[%s3056_s1] sm:$0x1] }
  0x15   :  { %v250_v36 = vrot.slane %v1901_v33, %v249_v31  ;;  %v258_v37 = vrot.slane %v1901_v33, %v257_v32  ;;  %v630_v61 = vld [vmem:[%s3060_s5 + $0x180] sm:$0xff]  ;;  %v615_v2 = vld [vmem:[%s3060_s5 + $0x108] sm:$0xff]  ;;  %v632_v3 = vld [vmem:[%s3060_s5 + $0x190] sm:$0xff] }
  0x16   :  { %v633_v4 = vld [vmem:[%s3060_s5 + $0x198] sm:$0xff]  ;;  %v634_v9 = vld [vmem:[%s3060_s5 + $0x1a0] sm:$0xff]  ;;  %v635_v10 = vld [vmem:[%s3060_s5 + $0x1a8] sm:$0xff] }
  0x17   :  { %v2280_v6 = vpack.c.bf16 %v633_v4, %v632_v3  ;;  %v617_v8 = vld [vmem:[%s3060_s5 + $0x118] sm:$0xff]  ;;  %v2284_v12 = vpack.c.bf16 %v635_v10, %v634_v9  ;;  %v619_v14 = vld [vmem:[%s3060_s5 + $0x128] sm:$0xff]  ;;  %v636_v15 = vld [vmem:[%s3060_s5 + $0x1b0] sm:$0xff] }
  0x18   :  { %v46_v3 = vld [vmem:[%s3061_s6 + $0xc8] sm:$0xff]  ;;  %v48_v9 = vld [vmem:[%s3061_s6 + $0x50] sm:$0xff] }
  0x19   :  { %v866_v10 = vld [vmem:[%s3059_s4 + $0x30] sm:$0x3] }
  0xd9   :  { %v2073_v19 = vpop.f32.mrb[0].mxu1 }
  0xda   :  { %v157_v20 = vadd.f32 %v2073_v19, %v32_v18  ;;  %v151_v21 = vpop.f32.mrb[1].mxu1 }
  0xdb   :  { %v152_v24 = vadd.f32 %v151_v21, %v32_v18  ;;  %v593_v18 = vld [vmem:[%s3060_s5 + $0x58] sm:$0xff]  ;;  %v611_v21 = vld [vmem:[%s3060_s5 + $0xe8] sm:$0xff] }
  0xdc   :  { %v161_v27 = vmax.f32 %v157_v20, 0.0  ;;  %v2266_v19 = vpack.c.bf16 %v593_v18, %v592_v16  ;;  %v610_v20 = vld [vmem:[%s3060_s5 + $0xe0] sm:$0xff]  ;;  %v637_v16 = vld [vmem:[%s3060_s5 + $0x1b8] sm:$0xff] }
  0xdd   :  { %v160_v25 = vmax.f32 %v152_v24, 0.0  ;;  %v2268_v23 = vpack.c.bf16 %v611_v21, %v610_v20  ;;  %v595_v24 = vld [vmem:[%s3060_s5 + $0x68] sm:$0xff]  ;;  %v2288_v18 = vpack.c.bf16 %v637_v16, %v636_v15  ;;  %v621_v20 = vld [vmem:[%s3060_s5 + $0x138] sm:$0xff]  ;;  %v638_v21 = vld [vmem:[%s3060_s5 + $0x1c0] sm:$0xff] }
  0xdf   :  { %2082 = vmatprep.mubr.msk.f32.mxu1 %vm162_vm2, %v160_v25  ;;  %v2270_v25 = vpack.c.bf16 %v595_v24, %v594_v22  ;;  %v639_v22 = vld [vmem:[%s3060_s5 + $0x1c8] sm:$0xff] }
  0xe0   :  { %2083 = vmatmul.mubr.msk.f32.vlgmr.msra.gmra.mrb[2].mxu1 %vm162_vm2, %v161_v27  ;;  %v613_v27 = vld [vmem:[%s3060_s5 + $0xf8] sm:$0xff]  ;;  %v2292_v24 = vpack.c.bf16 %v639_v22, %v638_v21 }
  0xe1   :  { %2231 = vmatpush1.bf16.msra.mxu1 %v2230_v26  ;;  %414 = vmatprep.mubr.f32.mxu1 %v2471_v40  ;;  %v612_v26 = vld [vmem:[%s3060_s5 + $0xf0] sm:$0xff] }
  0xe2   :  { %2233 = vmatprep.subr.bf16.mxu1 %v2232_v34  ;;  %v2272_v28 = vpack.c.bf16 %v613_v27, %v612_v26  ;;  %v253_v34 = vsub.s32 1, %v2705_v30  ;;  %v623_v26 = vld [vmem:[%s3060_s5 + $0x148] sm:$0xff]  ;;  %v640_v27 = vld [vmem:[%s3060_s5 + $0x1d0] sm:$0xff] }
  0xe4   :  { %v254_v38 = vrot.slane %v1901_v33, %v253_v34  ;;  %v625_v34 = vld [vmem:[%s3060_s5 + $0x158] sm:$0xff] }
  0xe5   :  { %2235 = vmatpush1.bf16.msra.mxu1 %v2234_v39  ;;  %v262_v39 = vrot.slane %v1901_v33, %v261_v35  ;;  %v624_v33 = vld [vmem:[%s3060_s5 + $0x150] sm:$0xff]  ;;  %v642_v35 = vld [vmem:[%s3060_s5 + $0x1e0] sm:$0xff] }
  0xe6   :  { %2245 = vmatprep.subr.bf16.mxu1 %v2244_v51 }
 0x1b3   :  { %v2084_v42 = vpop.f32.mrb[2].mxu1 }
 0x1b4   :  { %v235_v43 = vpop.f32.mrb[3].mxu1  ;;  %v241_v45 = vadd.f32 %v2084_v42, %v33_v41 }
 0x1b5   :  { %v236_v44 = vadd.f32 %v235_v43, %v33_v41 }
 0x1b6   :  { %v245_v47 = vmax.f32 %v241_v45, 0.0 }
 0x1b7   :  { %v244_v46 = vmax.f32 %v236_v44, 0.0 }
 0x1b9   :  { %1907 = vmatmul.mubr.msk.f32.vlgmr.msra.gmra.mrb[0].mxu0 %vm162_vm2, %v244_v46  ;;  %1909 = vmatmul.mubr.msk.f32.vlgmr.msra.gmra.mrb[4].mxu1 %vm162_vm2, %v244_v46 }
 0x1ba   :  { %343 = vmatprep.mubr.f32.mxu0 %v2471_v40  ;;  %420 = vmatprep.mubr.f32.mxu1 %v2471_v40 }
 0x1bb   :  { %2247 = vmatpush3.bf16.msra.mxu1 %v2246_v53 }
 0x1bc   :  { %2249 = vmatprep.subr.bf16.mxu1 %v2248_v58 }
 0x1bd   :  { %1908 = vmatmul.mubr.msk.f32.gmra.mrb[2].mxu0 %vm162_vm2, %v245_v47  ;;  %1910 = vmatmul.mubr.msk.f32.gmra.mrb[6].mxu1 %vm162_vm2, %v245_v47 }
 0x1be   :  { %504 = vmatprep.mubr.f32.mxu0 %v2471_v40 }
 0x1bf   :  { %2251 = vmatpush3.bf16.msra.mxu1 %v2250_v59 }
 0x1c0   :  { %2253 = vmatprep.subr.bf16.mxu1 %v2252_v62  ;;  %v631_v62 = vld [vmem:[%s3060_s5 + $0x188] sm:$0xff] }
 0x1c1   :  { %v2276_v0 = vpack.c.bf16 %v631_v62, %v630_v61  ;;  %v44_v61 = vld [vmem:[%s3061_s6 + $0x48] sm:$0xff] }
 0x1c3   :  { %2255 = vmatpush3.bf16.msra.mxu1 %v2254_v1  ;;  %v614_v1 = vld [vmem:[%s3060_s5 + $0x100] sm:$0xff] }
 0x1c4   :  { %2257 = vmatprep.subr.bf16.mxu1 %v2256_v5  ;;  %v2278_v5 = vpack.c.bf16 %v615_v2, %v614_v1  ;;  %v45_v2 = vld [vmem:[%s3061_s6 + $0x88] sm:$0xff] }
 0x1c5   :  { %v2312_v4 = vpack.c.bf16 %v46_v3, %v45_v2 }
 0x1c7   :  { %2259 = vmatpush3.bf16.msra.mxu1 %v2258_v7  ;;  %v616_v7 = vld [vmem:[%s3060_s5 + $0x110] sm:$0xff] }
 0x1c8   :  { %2261 = vmatprep.subr.bf16.mxu1 %v2260_v11  ;;  %v2282_v11 = vpack.c.bf16 %v617_v8, %v616_v7  ;;  %v47_v8 = vld [vmem:[%s3061_s6 + $0x10] sm:$0xff] }
 0x1cb   :  { %2263 = vmatpush3.bf16.msra.mxu1 %v2262_v13  ;;  %v618_v13 = vld [vmem:[%s3060_s5 + $0x120] sm:$0xff] }
 0x1cc   :  { %2265 = vmatprep.subr.bf16.mxu1 %v2264_v17  ;;  %v2286_v17 = vpack.c.bf16 %v619_v14, %v618_v13  ;;  %v49_v13 = vld [vmem:[%s3061_s6 + $0x90] sm:$0xff] }
 0x1cd   :  { %v50_v14 = vld [vmem:[%s3061_s6 + $0xd0] sm:$0xff] }
 0x1ce   :  { %v2915_v15 = vpack.c.bf16 %v50_v14, %v49_v13 }
 0x1cf   :  { %2267 = vmatpush3.bf16.msra.mxu1 %v2266_v19  ;;  %v620_v19 = vld [vmem:[%s3060_s5 + $0x130] sm:$0xff] }
 0x1d0   :  { %2269 = vmatprep.subr.bf16.mxu1 %v2268_v23  ;;  %v2290_v23 = vpack.c.bf16 %v621_v20, %v620_v19  ;;  %v34_v19 = vld [vmem:[%s3062_s7 + $0x2] ss:$0 sm:$0xff] }
 0x1d3   :  { %2271 = vmatpush3.bf16.msra.mxu1 %v2270_v25  ;;  %v622_v25 = vld [vmem:[%s3060_s5 + $0x140] sm:$0xff] }
 0x1d4   :  { %2273 = vmatprep.subr.bf16.mxu1 %v2272_v28  ;;  %v641_v28 = vld [vmem:[%s3060_s5 + $0x1d8] sm:$0xff]  ;;  %v2294_v29 = vpack.c.bf16 %v623_v26, %v622_v25 }
 0x1d5   :  { %v2296_v32 = vpack.c.bf16 %v641_v28, %v640_v27  ;;  %v38_v27 = vld [vmem:[%s3062_s7 + $0x5] ss:$0 sm:$0xff] }
 0x28c   :  { %v339_v41 = vpop.f32.mrb[0].mxu0  ;;  %v416_v42 = vpop.f32.mrb[4].mxu1 }
 0x28d   :  { %v340_v43 = vadd.f32 %v339_v41, %v250_v36  ;;  %v417_v44 = vadd.f32 %v416_v42, %v258_v37  ;;  %v341_v45 = vpop.f32.mrb[1].mxu0  ;;  %v418_v46 = vpop.f32.mrb[5].mxu1  ;;  %v627_v41 = vld [vmem:[%s3060_s5 + $0x168] sm:$0xff] }
 0x28e   :  { %v342_v47 = vadd.f32 %v341_v45, %v254_v38  ;;  %v419_v48 = vadd.f32 %v418_v46, %v262_v39  ;;  %v644_v46 = vld [vmem:[%s3060_s5 + $0x1f0] sm:$0xff] }
 0x28f   :  { %427 = vst [vmem:[%s3063_s8] sm:$0xff] %v340_v43  ;;  %429 = vst [vmem:[%s3063_s8 + $0x10] sm:$0xff] %v417_v44 }
 0x290   :  { %428 = vst [vmem:[%s3063_s8 + $0x8] sm:$0xff] %v342_v47  ;;  %430 = vst [vmem:[%s3063_s8 + $0x18] sm:$0xff] %v419_v48  ;;  %v345_v49 = vpop.f32.mrb[2].mxu0  ;;  %v422_v50 = vpop.f32.mrb[6].mxu1 }
 0x291   :  { %v346_v51 = vadd.f32 %v345_v49, %v250_v36  ;;  %v423_v52 = vadd.f32 %v422_v50, %v258_v37  ;;  %v347_v53 = vpop.f32.mrb[3].mxu0  ;;  %v424_v54 = vpop.f32.mrb[7].mxu1  ;;  %v643_v36 = vld [vmem:[%s3060_s5 + $0x1e8] sm:$0xff]  ;;  %v2298_v37 = vpack.c.bf16 %v625_v34, %v624_v33  ;;  %v628_v49 = vld [vmem:[%s3060_s5 + $0x170] sm:$0xff]  ;;  %v629_v50 = vld [vmem:[%s3060_s5 + $0x178] sm:$0xff] }
 0x292   :  { %v348_v55 = vadd.f32 %v347_v53, %v254_v38  ;;  %v425_v56 = vadd.f32 %v424_v54, %v262_v39  ;;  %v2300_v38 = vpack.c.bf16 %v643_v36, %v642_v35  ;;  %v626_v39 = vld [vmem:[%s3060_s5 + $0x160] sm:$0xff] }
 0x293   :  { %431 = vst [vmem:[%s3063_s8 + $0x20] sm:$0xff] %v346_v51  ;;  %v2238_v57 = vpack.c.bf16 %v346_v51, %v340_v43  ;;  %433 = vst [vmem:[%s3063_s8 + $0x30] sm:$0xff] %v423_v52  ;;  %v2242_v58 = vpack.c.bf16 %v423_v52, %v417_v44  ;;  %v2302_v42 = vpack.c.bf16 %v627_v41, %v626_v39  ;;  %v596_v43 = vld [vmem:[%s3060_s5 + $0x70] sm:$0xff]  ;;  %v597_v44 = vld [vmem:[%s3060_s5 + $0x78] sm:$0xff]  ;;  %v2472_v52 = vmov 0.0|0.0  }
 0x294   :  { %432 = vst [vmem:[%s3063_s8 + $0x28] sm:$0xff] %v348_v55  ;;  %v2236_v59 = vpack.c.bf16 %v348_v55, %v342_v47  ;;  %434 = vst [vmem:[%s3063_s8 + $0x38] sm:$0xff] %v425_v56  ;;  %v2240_v60 = vpack.c.bf16 %v425_v56, %v419_v48  ;;  %v2274_v45 = vpack.c.bf16 %v597_v44, %v596_v43  ;;  %v645_v47 = vld [vmem:[%s3060_s5 + $0x1f8] sm:$0xff]  ;;  %v860_v55 = vld [vmem:[%s3059_s4] sm:$0xff] }
 0x295   :  { %v2304_v48 = vpack.c.bf16 %v645_v47, %v644_v46  ;;  %v2306_v51 = vpack.c.bf16 %v629_v50, %v628_v49  ;;  %v861_v56 = vld [vmem:[%s3059_s4 + $0x8] sm:$0xff] }
 0x296   :  { %2237 = vmatprep.subr.bf16.mxu0 %v2236_v59  ;;  %2275 = vmatpush3.bf16.msra.mxu1 %v2274_v45 }
 0x297   :  { %2239 = vmatpush1.bf16.msra.mxu0 %v2238_v57  ;;  %2308 = vmatprep.subr.bf16.mxu1 %v2472_v52 }
 0x298   :  { %2241 = vmatprep.subr.bf16.mxu0 %v2240_v60  ;;  %v43_v60 = vld [vmem:[%s3061_s6 + $0x8] sm:$0xff] }
 0x299   :  { %v2309_v62 = vpack.c.bf16 %v44_v61, %v43_v60 }
 0x29a   :  { %1911 = vmatmul.mubr.msk.f32.vlgmr.msra.gmra.mrb[4].mxu0 %vm436_vm3, %v435_v63 }
 0x29b   :  { %2243 = vmatpush1.bf16.msra.mxu0 %v2242_v58  ;;  %575 = vmatprep.mubr.f32.mxu0 %v2471_v40  ;;  %v2315_v58 = vpack.c.bf16 %v861_v56, %v860_v55 }
 0x29c   :  { %2277 = vmatprep.subr.bf16.mxu0 %v2276_v0  ;;  %v863_v0 = vld [vmem:[%s3059_s4 + $0x18] sm:$0xff] }
 0x29e   :  { %1912 = vmatmul.mubr.msk.f32.vlgmr.msra.gmra.mrb[6].mxu0 %vm436_vm3, %v435_v63  ;;  %v862_v63 = vld [vmem:[%s3059_s4 + $0x10] sm:$0xff] }
 0x29f   :  { %2279 = vmatpush3.bf16.msra.mxu0 %v2278_v5  ;;  %v2318_v1 = vpack.c.bf16 %v863_v0, %v862_v63  ;;  %v864_v5 = vld [vmem:[%s3059_s4 + $0x20] sm:$0xff] }
 0x2a0   :  { %2281 = vmatprep.subr.bf16.mxu0 %v2280_v6  ;;  %v865_v6 = vld [vmem:[%s3059_s4 + $0x28] sm:$0xff] }
 0x2a1   :  { %v2321_v7 = vpack.c.bf16 %v865_v6, %v864_v5 }
 0x2a3   :  { %2283 = vmatpush3.bf16.msra.mxu0 %v2282_v11  ;;  %v859_v11 = vld [vmem:[%s3057_s2] sm:$0xff] }
 0x2a4   :  { %2285 = vmatprep.subr.bf16.mxu0 %v2284_v12  ;;  %v2901_v12 = vpack.c.bf16 %v48_v9, %v47_v8 }
 0x2a7   :  { %2287 = vmatpush3.bf16.msra.mxu0 %v2286_v17 }
 0x2a8   :  { %2289 = vmatprep.subr.bf16.mxu0 %v2288_v18 }
 0x2ab   :  { %2291 = vmatpush3.bf16.msra.mxu0 %v2290_v23 }
 0x2ac   :  { %2293 = vmatprep.subr.bf16.mxu0 %v2292_v24 }
 0x2af   :  { %2295 = vmatpush3.bf16.msra.mxu0 %v2294_v29 }
 0x2b0   :  { %2297 = vmatprep.subr.bf16.mxu0 %v2296_v32 }
 0x2b3   :  { %2299 = vmatpush3.bf16.msra.mxu0 %v2298_v37 }
 0x2b4   :  { %2301 = vmatprep.subr.bf16.mxu0 %v2300_v38 }
 0x2b7   :  { %2303 = vmatpush3.bf16.msra.mxu0 %v2302_v42 }
 0x2b8   :  { %2305 = vmatprep.subr.bf16.mxu0 %v2304_v48 }
 0x2bb   :  { %2307 = vmatpush3.bf16.msra.mxu0 %v2306_v51 }
 0x2bc   :  { %2314 = vmatprep.subr.bf16.mxu0 %v2472_v52 }
 0x36d   :  { %v506_v53 = vpop.f32.mrb[4].mxu0 }
 0x36e   :  { %v508_v54 = vpop.f32.mrb[5].mxu0 }
 0x36f   :  { %710 = vmatprep.mubr.f32.mxu1 %v508_v54 }
 0x370   :  { %711 = vmatmul.mubr.f32.vlgmr.msra.gmra.mrb[8].mxu1 %v506_v53 }
 0x371   :  { %v577_v57 = vpop.f32.mrb[6].mxu0  ;;  %2310 = vmatpush3.bf16.msra.mxu1 %v2309_v62  ;;  %2093 = vmatprep.mubr.msk.f32.mxu1 %vm2473_vm4, %v2471_v40 }
 0x372   :  { %v579_v59 = vpop.f32.mrb[7].mxu0  ;;  %2311 = vmatprep.subr.bf16.mxu1 %v2472_v52 }
 0x373   :  { %780 = vmatprep.mubr.f32.mxu0 %v579_v59 }
 0x374   :  { %781 = vmatmul.mubr.f32.vlgmr.msra.gmra.mrb[8].mxu0 %v577_v57 }
 0x375   :  { %2316 = vmatpush3.bf16.msra.mxu0 %v2315_v58  ;;  %2313 = vmatpush3.bf16.msra.mxu1 %v2312_v4 }
 0x376   :  { %2317 = vmatprep.subr.bf16.mxu0 %v2472_v52  ;;  %2323 = vmatprep.subr.bf16.mxu1 %v2472_v52 }
 0x377   :  { %2110 = vmatprep.mubr.msk.f32.mxu0 %vm2473_vm4, %v2471_v40 }
 0x379   :  { %2319 = vmatpush3.bf16.msra.mxu0 %v2318_v1 }
 0x37a   :  { %2320 = vmatprep.subr.bf16.mxu0 %v2472_v52 }
 0x37d   :  { %2322 = vmatpush3.bf16.msra.mxu0 %v2321_v7 }
 0x37e   :  { %2108 = vmatprep.subr.mxu0 %v2471_v40 }
 0x381   :  { %2109 = vmatpush3.msk.msra.mxu0 %vm81_vm0, %v866_v10 }
 0x382   :  { %2111 = vmatmul.mubr.msk.f32.vlgmr.msra.gmra.mrb[10].mxu0 %vm871_vm5, %v859_v11  ;;  %2335 = vmatprep.subr.bf16.mxu0 %v2472_v52 }
 0x383   :  { %2337 = vmatpush3.bf16.msra.mxu0 %v2901_v12  ;;  %2143 = vmatprep.mubr.msk.f32.mxu0 %vm2473_vm4, %v2471_v40 }
 0x384   :  { %2338 = vmatprep.subr.bf16.mxu0 %v2472_v52 }
 0x387   :  { %2340 = vmatpush3.bf16.msra.mxu0 %v2915_v15 }
 0x388   :  { %2347 = vmatprep.subr.bf16.mxu0 %v2472_v52 }
 0x443   :  { %v1973_v16 = vpop.f32.mrb[8].mxu1 }
 0x444   :  { %v1974_v17 = vpop.f32.mrb[9].mxu1 }
 0x445   :  { %v1975_v18 = vadd.f32 %v1974_v17, %v1973_v16 }
 0x447   :  { %v2008_v20 = vpop.f32.mrb[8].mxu0  ;;  %v713_v22 = vadd.f32 %v1975_v18, %v34_v19 }
 0x448   :  { %v2009_v21 = vpop.f32.mrb[9].mxu0 }
 0x449   :  { %v2010_v23 = vadd.f32 %v2009_v21, %v2008_v20 }
 0x44b   :  { %v783_v24 = vadd.f32 %v2010_v23, %v713_v22 }
 0x44d   :  { %2094 = vmatmul.mubr.msk.f32.vlgmr.msra.gmra.mrb[10].mxu1 %vm162_vm2, %v783_v24 }
 0x44e   :  { %2325 = vmatpush3.bf16.msra.mxu1 %v2901_v12  ;;  %2121 = vmatprep.mubr.msk.f32.mxu1 %vm2473_vm4, %v2471_v40 }
 0x44f   :  { %2326 = vmatprep.subr.bf16.mxu1 %v2472_v52 }
 0x452   :  { %2328 = vmatpush3.bf16.msra.mxu1 %v2915_v15 }
 0x453   :  { %2329 = vmatprep.subr.bf16.mxu1 %v2472_v52 }
 0x455   :  { %2122 = vmatmul.mubr.f32.vlgmr.msra.gmra.mrb[12].mxu1 %v2471_v40  ;;  %v944_v25 = vpop.f32.mrb[10].mxu0 }
 0x456   :  { %2331 = vmatpush3.bf16.msra.mxu1 %v2901_v12  ;;  %2132 = vmatprep.mubr.msk.f32.mxu1 %vm2473_vm4, %v2471_v40  ;;  %v2112_v26 = vpop.f32.mrb[11].mxu0 }
 0x457   :  { %2332 = vmatprep.subr.bf16.mxu1 %v2472_v52 }
 0x45a   :  { %2334 = vmatpush3.bf16.msra.mxu1 %v2915_v15 }
 0x45b   :  { %2341 = vmatprep.subr.bf16.mxu1 %v2472_v52 }
 0x520   :  { %v855_v28 = vpop.f32.mrb[10].mxu1 }
 0x521   :  { %v856_v29 = vadd.f32 %v855_v28, %v38_v27  ;;  %v2095_v32 = vpop.f32.mrb[11].mxu1 }
 0x523   :  { %v870_v33 = vrot.slane %v856_v29, %v249_v31 }
 0x525   :  { %v2941_v34 = vadd.f32 %v944_v25, %v870_v33 }
 0x528   :  { %v1017_v35 = vpop.f32.mrb[12].mxu1 }
 0x529   :  { %v1021_v36 = vadd.f32 %v1017_v35, %v2941_v34  ;;  %v2123_v37 = vpop.f32.mrb[13].mxu1 }
 0x52b   :  { %2383 = vtanh.f32 %v1021_v36  ;;  %v1916_v39 = vmul.f32 -1.442695, %v1021_v36 }
 0x52d   :  { %2385 = vpow2.f32 %v1916_v39 }
 0x535   :  { %v2384_v38 = vpop.eup %2383 }
 0x536   :  { %1031 = vrot.lane.b32.xlu0 %v2384_v38, %s2474_s22 }
 0x537   :  { %v2386_v41 = vpop.eup %2385 }
 0x538   :  { %v1025_v42 = vadd.f32 1.0, %v2386_v41 }
 0x53a   :  { %2387 = vrcp.f32 %v1025_v42 }
 0x544   :  { %v2388_v43 = vpop.eup %2387 }
 0x545   :  { %v1029_v31 = vmul.f32 0.0, %v2388_v43 }
 0x5a8   :  { %v1032_v44 = vpop.permute.xlu0 %1031 }
 0x5a9   :  { %v1034_v30 = vmul.f32 %v2388_v43, %v1032_v44 }
 0x5ab   :  { %1036 = vrot.lane.b32.xlu0 %v1034_v30, %s2475_s23 }
 0x61d   :  { %v1037_v45 = vpop.permute.xlu0 %1036 }
 0x61e   :  { %v1039_v46 = vadd.f32 %v1037_v45, %v1029_v31 }
 0x620   :  { %2389 = vtanh.f32 %v1039_v46  ;;  %v1133_v63 = vrot.slane %v1039_v46, 7 }
 0x62a   :  { %v2390_v47 = vpop.eup %2389 }
 0x62b   :  { %1042 = vrot.lane.b32.xlu1 %v2390_v47, %s2474_s22 }
 0x69d   :  { %v1043_v48 = vpop.permute.xlu1 %1042 }
 0x69e   :  { %v2947_v49 = vmul.f32 %v2388_v43, %v1043_v48 }
 0x6a0   :  { %1047 = vrot.lane.b32.xlu1 %v2947_v49, %s2475_s23 }
 0x712   :  { %v1048_v50 = vpop.permute.xlu1 %1047 }
 0x713   :  { %2133 = vmatmul.mubr.msk.f32.vlgmr.msra.gmra.mrb[14].mxu1 %vm162_vm2, %v1048_v50 }
 0x714   :  { %2343 = vmatpush3.bf16.msra.mxu1 %v2901_v12  ;;  %2154 = vmatprep.mubr.msk.f32.mxu1 %vm2473_vm4, %v2471_v40 }
 0x715   :  { %2344 = vmatprep.subr.bf16.mxu1 %v2472_v52 }
 0x718   :  { %2346 = vmatpush3.bf16.msra.mxu1 %v2915_v15 }
 0x719   :  { %2353 = vmatprep.subr.bf16.mxu1 %v2472_v52 }
 0x7e6   :  { %v1117_v51 = vpop.f32.mrb[14].mxu1 }
 0x7e7   :  { %v1122_v53 = vrot.slane %v1117_v51, 7  ;;  %v2134_v54 = vpop.f32.mrb[15].mxu1 }
 0x7e9   :  { %v1124_v55 = vadd.f32 %v1122_v53, %v2941_v34 }
 0x7eb   :  { %2391 = vtanh.f32 %v1124_v55  ;;  %v1918_v57 = vmul.f32 -1.442695, %v1124_v55 }
 0x7ed   :  { %2393 = vpow2.f32 %v1918_v57 }
 0x7f5   :  { %v2392_v56 = vpop.eup %2391 }
 0x7f6   :  { %1137 = vrot.lane.b32.xlu0 %v2392_v56, %s2474_s22 }
 0x7f7   :  { %v2394_v58 = vpop.eup %2393 }
 0x7f8   :  { %v1128_v59 = vadd.f32 1.0, %v2394_v58 }
 0x7fa   :  { %2395 = vrcp.f32 %v1128_v59 }
 0x804   :  { %v2396_v60 = vpop.eup %2395 }
 0x805   :  { %v1135_v0 = vmul.f32 %v2396_v60, %v1133_v63 }
 0x868   :  { %v1138_v61 = vpop.permute.xlu0 %1137 }
 0x869   :  { %v1140_v62 = vmul.f32 %v2396_v60, %v1138_v61 }
 0x86b   :  { %1142 = vrot.lane.b32.xlu1 %v1140_v62, %s2475_s23 }
 0x8dd   :  { %v1143_v1 = vpop.permute.xlu1 %1142 }
 0x8de   :  { %v1145_v2 = vadd.f32 %v1143_v1, %v1135_v0 }
 0x8e0   :  { %2397 = vtanh.f32 %v1145_v2  ;;  %v1240_v21 = vrot.slane %v1145_v2, 7 }
 0x8ea   :  { %v2398_v3 = vpop.eup %2397 }
 0x8eb   :  { %1148 = vrot.lane.b32.xlu0 %v2398_v3, %s2474_s22 }
 0x95d   :  { %v1149_v4 = vpop.permute.xlu0 %1148 }
 0x95e   :  { %v1151_v5 = vmul.f32 %v2396_v60, %v1149_v4 }
 0x960   :  { %v1153_v6 = vrot.slane %v1151_v5, 1  ;;  %v1795_v28 = vsel %vm1794_vm6, %v2947_v49, %v1151_v5 }
 0x962   :  { %1154 = vrot.lane.b32.xlu1 %v1153_v6, %s2475_s23 }
 0x9d4   :  { %v1155_v7 = vpop.permute.xlu1 %1154 }
 0x9d5   :  { %2144 = vmatmul.mubr.msk.f32.vlgmr.msra.gmra.mrb[12].mxu0 %vm162_vm2, %v1155_v7 }
 0x9d6   :  { %2349 = vmatpush3.bf16.msra.mxu0 %v2901_v12  ;;  %2165 = vmatprep.mubr.msk.f32.mxu0 %vm2473_vm4, %v2471_v40 }
 0x9d7   :  { %2350 = vmatprep.subr.bf16.mxu0 %v2472_v52 }
 0x9da   :  { %2352 = vmatpush3.bf16.msra.mxu0 %v2915_v15 }
 0x9db   :  { %2359 = vmatprep.subr.bf16.mxu0 %v2472_v52 }
 0xaa8   :  { %v1224_v8 = vpop.f32.mrb[12].mxu0 }
 0xaa9   :  { %v1229_v9 = vrot.slane %v1224_v8, 6  ;;  %v2145_v10 = vpop.f32.mrb[13].mxu0 }
 0xaab   :  { %v1231_v11 = vadd.f32 %v1229_v9, %v2941_v34 }
 0xaad   :  { %2399 = vtanh.f32 %v1231_v11  ;;  %v1920_v14 = vmul.f32 -1.442695, %v1231_v11 }
 0xaaf   :  { %2401 = vpow2.f32 %v1920_v14 }
 0xab7   :  { %v2400_v13 = vpop.eup %2399 }
 0xab8   :  { %1244 = vrot.lane.b32.xlu0 %v2400_v13, %s2474_s22 }
 0xab9   :  { %v2402_v16 = vpop.eup %2401 }
 0xaba   :  { %v1235_v17 = vadd.f32 1.0, %v2402_v16 }
 0xabc   :  { %2403 = vrcp.f32 %v1235_v17 }
 0xac6   :  { %v2404_v18 = vpop.eup %2403 }
 0xac7   :  { %v1242_v22 = vmul.f32 %v2404_v18, %v1240_v21 }
 0xb2a   :  { %v1245_v19 = vpop.permute.xlu0 %1244 }
 0xb2b   :  { %v1247_v20 = vmul.f32 %v2404_v18, %v1245_v19 }
 0xb2d   :  { %1249 = vrot.lane.b32.xlu1 %v1247_v20, %s2475_s23 }
 0xb9f   :  { %v1250_v23 = vpop.permute.xlu1 %1249 }
 0xba0   :  { %v1252_v24 = vadd.f32 %v1250_v23, %v1242_v22 }
 0xba2   :  { %2405 = vtanh.f32 %v1252_v24  ;;  %v1347_v45 = vrot.slane %v1252_v24, 7 }
 0xbac   :  { %v2406_v25 = vpop.eup %2405 }
 0xbad   :  { %1255 = vrot.lane.b32.xlu0 %v2406_v25, %s2474_s22 }
 0xc1f   :  { %v1256_v26 = vpop.permute.xlu0 %1255 }
 0xc20   :  { %v1258_v27 = vmul.f32 %v2404_v18, %v1256_v26 }
 0xc22   :  { %v1260_v29 = vrot.slane %v1258_v27, 2  ;;  %v1796_v32 = vsel %vm81_vm0, %v1795_v28, %v1258_v27 }
 0xc24   :  { %1261 = vrot.lane.b32.xlu1 %v1260_v29, %s2475_s23 }
 0xc96   :  { %v1262_v33 = vpop.permute.xlu1 %1261 }
 0xc97   :  { %2155 = vmatmul.mubr.msk.f32.vlgmr.msra.gmra.mrb[16].mxu1 %vm162_vm2, %v1262_v33 }
 0xc98   :  { %2355 = vmatpush3.bf16.msra.mxu1 %v2901_v12  ;;  %2176 = vmatprep.mubr.msk.f32.mxu1 %vm2473_vm4, %v2471_v40 }
 0xc99   :  { %2356 = vmatprep.subr.bf16.mxu1 %v2472_v52 }
 0xc9c   :  { %2358 = vmatpush3.bf16.msra.mxu1 %v2915_v15 }
 0xc9d   :  { %2365 = vmatprep.subr.bf16.mxu1 %v2472_v52 }
 0xd6a   :  { %v1331_v35 = vpop.f32.mrb[16].mxu1 }
 0xd6b   :  { %v1336_v36 = vrot.slane %v1331_v35, 5  ;;  %v2156_v37 = vpop.f32.mrb[17].mxu1 }
 0xd6d   :  { %v1338_v38 = vadd.f32 %v1336_v36, %v2941_v34 }
 0xd6f   :  { %2407 = vtanh.f32 %v1338_v38  ;;  %v1922_v41 = vmul.f32 -1.442695, %v1338_v38 }
 0xd71   :  { %2409 = vpow2.f32 %v1922_v41 }
 0xd79   :  { %v2408_v39 = vpop.eup %2407 }
 0xd7a   :  { %1351 = vrot.lane.b32.xlu0 %v2408_v39, %s2474_s22 }
 0xd7b   :  { %v2410_v42 = vpop.eup %2409 }
 0xd7c   :  { %v1342_v43 = vadd.f32 1.0, %v2410_v42 }
 0xd7e   :  { %2411 = vrcp.f32 %v1342_v43 }
 0xd88   :  { %v2412_v44 = vpop.eup %2411 }
 0xd89   :  { %v1349_v46 = vmul.f32 %v2412_v44, %v1347_v45 }
 0xdec   :  { %v1352_v30 = vpop.permute.xlu0 %1351 }
 0xded   :  { %v1354_v31 = vmul.f32 %v2412_v44, %v1352_v30 }
 0xdef   :  { %1356 = vrot.lane.b32.xlu1 %v1354_v31, %s2475_s23 }
 0xe61   :  { %v1357_v47 = vpop.permute.xlu1 %1356 }
 0xe62   :  { %v1359_v48 = vadd.f32 %v1357_v47, %v1349_v46 }
 0xe64   :  { %2413 = vtanh.f32 %v1359_v48  ;;  %v1454_v3 = vrot.slane %v1359_v48, 7 }
 0xe6e   :  { %v2414_v49 = vpop.eup %2413 }
 0xe6f   :  { %1362 = vrot.lane.b32.xlu0 %v2414_v49, %s2474_s22 }
 0xee1   :  { %v1363_v50 = vpop.permute.xlu0 %1362 }
 0xee2   :  { %v1365_v51 = vmul.f32 %v2412_v44, %v1363_v50 }
 0xee4   :  { %v1367_v53 = vrot.slane %v1365_v51, 3  ;;  %v1798_v54 = vsel %vm1797_vm7, %v1796_v32, %v1365_v51 }
 0xee6   :  { %1368 = vrot.lane.b32.xlu1 %v1367_v53, %s2475_s23 }
 0xf58   :  { %v1369_v55 = vpop.permute.xlu1 %1368 }
 0xf59   :  { %2166 = vmatmul.mubr.msk.f32.vlgmr.msra.gmra.mrb[14].mxu0 %vm162_vm2, %v1369_v55 }
 0xf5a   :  { %2361 = vmatpush3.bf16.msra.mxu0 %v2901_v12  ;;  %2187 = vmatprep.mubr.msk.f32.mxu0 %vm2473_vm4, %v2471_v40 }
 0xf5b   :  { %2362 = vmatprep.subr.bf16.mxu0 %v2472_v52 }
 0xf5e   :  { %2364 = vmatpush3.bf16.msra.mxu0 %v2915_v15 }
 0xf5f   :  { %2371 = vmatprep.subr.bf16.mxu0 %v2472_v52 }
0x102c   :  { %v1438_v56 = vpop.f32.mrb[14].mxu0 }
0x102d   :  { %v1443_v57 = vrot.slane %v1438_v56, 4  ;;  %v2167_v58 = vpop.f32.mrb[15].mxu0 }
0x102f   :  { %v1445_v59 = vadd.f32 %v1443_v57, %v2941_v34 }
0x1031   :  { %2415 = vtanh.f32 %v1445_v59  ;;  %v1924_v61 = vmul.f32 -1.442695, %v1445_v59 }
0x1033   :  { %2417 = vpow2.f32 %v1924_v61 }
0x103b   :  { %v2416_v60 = vpop.eup %2415 }
0x103c   :  { %1458 = vrot.lane.b32.xlu0 %v2416_v60, %s2474_s22 }
0x103d   :  { %v2418_v62 = vpop.eup %2417 }
0x103e   :  { %v1449_v63 = vadd.f32 1.0, %v2418_v62 }
0x1040   :  { %2419 = vrcp.f32 %v1449_v63 }
0x104a   :  { %v2420_v0 = vpop.eup %2419 }
0x104b   :  { %v1456_v4 = vmul.f32 %v2420_v0, %v1454_v3 }
0x10ae   :  { %v1459_v1 = vpop.permute.xlu0 %1458 }
0x10af   :  { %v1461_v2 = vmul.f32 %v2420_v0, %v1459_v1 }
0x10b1   :  { %1463 = vrot.lane.b32.xlu1 %v1461_v2, %s2475_s23 }
0x1123   :  { %v1464_v5 = vpop.permute.xlu1 %1463 }
0x1124   :  { %v1466_v6 = vadd.f32 %v1464_v5, %v1456_v4 }
0x1126   :  { %2421 = vtanh.f32 %v1466_v6 }
0x1130   :  { %v2422_v7 = vpop.eup %2421 }
0x1131   :  { %1469 = vrot.lane.b32.xlu0 %v2422_v7, %s2474_s22 }
0x11a3   :  { %v1470_v8 = vpop.permute.xlu0 %1469 }
0x11a4   :  { %v1472_v9 = vmul.f32 %v2420_v0, %v1470_v8  ;;  %v52_v8 = vld [vmem:[%s3061_s6 + $0x58] sm:$0xff] }
0x11a6   :  { %v1474_v10 = vrot.slane %v1472_v9, 4  ;;  %v1800_v11 = vsel %vm1799_vm8, %v1798_v54, %v1472_v9  ;;  %v53_v9 = vld [vmem:[%s3061_s6 + $0x98] sm:$0xff] }
0x11a8   :  { %1475 = vrot.lane.b32.xlu1 %v1474_v10, %s2475_s23 }
0x121a   :  { %v1476_v13 = vpop.permute.xlu1 %1475 }
0x121b   :  { %2177 = vmatmul.mubr.msk.f32.vlgmr.msra.gmra.mrb[18].mxu1 %vm162_vm2, %v1476_v13 }
0x121c   :  { %2367 = vmatpush3.bf16.msra.mxu1 %v2901_v12  ;;  %2198 = vmatprep.mubr.msk.f32.mxu1 %vm2473_vm4, %v2471_v40 }
0x121d   :  { %2368 = vmatprep.subr.bf16.mxu1 %v2472_v52 }
0x1220   :  { %2370 = vmatpush3.bf16.msra.mxu1 %v2915_v15  ;;  %v1561_v15 = vrot.slane %v1466_v6, 7 }
0x12ee   :  { %v1545_v14 = vpop.f32.mrb[18].mxu1 }
0x12ef   :  { %v1550_v16 = vrot.slane %v1545_v14, 3  ;;  %v2178_v17 = vpop.f32.mrb[19].mxu1 }
0x12f1   :  { %v1552_v18 = vadd.f32 %v1550_v16, %v2941_v34 }
0x12f3   :  { %2423 = vtanh.f32 %v1552_v18  ;;  %v1926_v20 = vmul.f32 -1.442695, %v1552_v18 }
0x12f5   :  { %2425 = vpow2.f32 %v1926_v20  ;;  %v37_v20 = vld [vmem:[%s3062_s7 + $0x4] ss:$0 sm:$0xff] }
0x12fd   :  { %v2424_v19 = vpop.eup %2423 }
0x12fe   :  { %1565 = vrot.lane.b32.xlu0 %v2424_v19, %s2474_s22 }
0x12ff   :  { %v2426_v21 = vpop.eup %2425 }
0x1300   :  { %v1556_v12 = vadd.f32 1.0, %v2426_v21 }
0x1302   :  { %2427 = vrcp.f32 %v1556_v12 }
0x130c   :  { %v2428_v22 = vpop.eup %2427 }
0x130d   :  { %v1563_v25 = vmul.f32 %v2428_v22, %v1561_v15 }
0x1370   :  { %v1566_v23 = vpop.permute.xlu0 %1565 }
0x1371   :  { %v1568_v24 = vmul.f32 %v2428_v22, %v1566_v23 }
0x1373   :  { %1570 = vrot.lane.b32.xlu1 %v1568_v24, %s2475_s23 }
0x13e5   :  { %v1571_v26 = vpop.permute.xlu1 %1570 }
0x13e6   :  { %v1573_v27 = vadd.f32 %v1571_v26, %v1563_v25 }
0x13e8   :  { %2429 = vtanh.f32 %v1573_v27 }
0x13f2   :  { %v2430_v28 = vpop.eup %2429 }
0x13f3   :  { %1576 = vrot.lane.b32.xlu0 %v2430_v28, %s2474_s22 }
0x1465   :  { %v1577_v29 = vpop.permute.xlu0 %1576 }
0x1466   :  { %v1579_v32 = vmul.f32 %v2428_v22, %v1577_v29 }
0x1468   :  { %v1581_v33 = vrot.slane %v1579_v32, 5  ;;  %v1802_v35 = vsel %vm1801_vm9, %v1800_v11, %v1579_v32  ;;  %v54_v11 = vld [vmem:[%s3061_s6 + $0xd8] sm:$0xff] }
0x1469   :  { %v2375_v13 = vpack.c.bf16 %v54_v11, %v53_v9 }
0x146a   :  { %1582 = vrot.lane.b32.xlu1 %v1581_v33, %s2475_s23 }
0x14dc   :  { %v1583_v36 = vpop.permute.xlu1 %1582 }
0x14dd   :  { %2188 = vmatmul.mubr.msk.f32.vlgmr.msra.gmra.mrb[16].mxu0 %vm162_vm2, %v1583_v36 }
0x14de   :  { %2209 = vmatprep.mubr.msk.f32.mxu0 %vm2473_vm4, %v2471_v40  ;;  %v1668_v40 = vrot.slane %v1573_v27, 7 }
0x15b0   :  { %v1652_v37 = vpop.f32.mrb[16].mxu0 }
0x15b1   :  { %v1657_v38 = vrot.slane %v1652_v37, 2  ;;  %v2189_v39 = vpop.f32.mrb[17].mxu0 }
0x15b3   :  { %v1659_v41 = vadd.f32 %v1657_v38, %v2941_v34 }
0x15b5   :  { %2431 = vtanh.f32 %v1659_v41  ;;  %v1928_v43 = vmul.f32 -1.442695, %v1659_v41 }
0x15b7   :  { %2433 = vpow2.f32 %v1928_v43 }
0x15bf   :  { %v2432_v42 = vpop.eup %2431 }
0x15c0   :  { %1672 = vrot.lane.b32.xlu0 %v2432_v42, %s2474_s22 }
0x15c1   :  { %v2434_v44 = vpop.eup %2433 }
0x15c2   :  { %v1663_v30 = vadd.f32 1.0, %v2434_v44 }
0x15c4   :  { %2435 = vrcp.f32 %v1663_v30 }
0x15ce   :  { %v2436_v31 = vpop.eup %2435 }
0x15cf   :  { %v1670_v47 = vmul.f32 %v2436_v31, %v1668_v40 }
0x1632   :  { %v1673_v45 = vpop.permute.xlu0 %1672 }
0x1633   :  { %v1675_v46 = vmul.f32 %v2436_v31, %v1673_v45 }
0x1635   :  { %1677 = vrot.lane.b32.xlu1 %v1675_v46, %s2475_s23 }
0x16a7   :  { %v1678_v48 = vpop.permute.xlu1 %1677 }
0x16a8   :  { %v1680_v49 = vadd.f32 %v1678_v48, %v1670_v47 }
0x16aa   :  { %2437 = vtanh.f32 %v1680_v49  ;;  %v1775_v4 = vrot.slane %v1680_v49, 7 }
0x16b4   :  { %v2438_v50 = vpop.eup %2437 }
0x16b5   :  { %1683 = vrot.lane.b32.xlu0 %v2438_v50, %s2474_s22 }
0x1727   :  { %v1684_v51 = vpop.permute.xlu0 %1683 }
0x1728   :  { %v1686_v53 = vmul.f32 %v2436_v31, %v1684_v51 }
0x172a   :  { %v1688_v54 = vrot.slane %v1686_v53, 6  ;;  %v1804_v55 = vsel %vm1803_vm10, %v1802_v35, %v1686_v53 }
0x172c   :  { %1689 = vrot.lane.b32.xlu1 %v1688_v54, %s2475_s23 }
0x179e   :  { %v1690_v56 = vpop.permute.xlu1 %1689 }
0x179f   :  { %2199 = vmatmul.mubr.msk.f32.vlgmr.msra.gmra.mrb[20].mxu1 %vm162_vm2, %v1690_v56 }
0x1872   :  { %v1759_v57 = vpop.f32.mrb[20].mxu1 }
0x1873   :  { %v1764_v58 = vrot.slane %v1759_v57, 1  ;;  %v2200_v59 = vpop.f32.mrb[21].mxu1 }
0x1875   :  { %v1766_v60 = vadd.f32 %v1764_v58, %v2941_v34  ;;  %v51_v34 = vld [vmem:[%s3061_s6 + $0x18] sm:$0xff]  ;;  %s2476_s6 = smov [#allocation2]  }
0x1876   :  { %v2372_v10 = vpack.c.bf16 %v52_v8, %v51_v34  ;;  %s1891_s1 = sshll.u32 %s2476_s6, 4  ;;  %s1892_s1 = int_to_ptr.vmem [resolvable:$true] %s1891_s1 }
0x1877   :  { %2439 = vtanh.f32 %v1766_v60  ;;  %v1930_v62 = vmul.f32 -1.442695, %v1766_v60  ;;  %s2447_s12 = scalar_lea.vmem %s1892_s1, 128  ;;  %p2452_p1 = scmp.lt.s32.totalorder %s1892_s1, %s1892_s1 }
0x1878   :  { %2373 = vmatpush3.bf16.msra.mxu0 %v2372_v10  ;;  %p2448_p0 = scmp.ne.s32.totalorder %s1892_s1, %s2447_s12  ;;  %p2453_p2 = scmp.lt.s32.totalorder %s2447_s12, %s2447_s12 }
0x1879   :  { %2441 = vpow2.f32 %v1930_v62  ;;  %2374 = vmatprep.subr.bf16.mxu0 %v2472_v52 }
0x187a   :  { %p2454_p3 = por %p2453_p2, %p2452_p1 }
0x187c   :  { %2376 = vmatpush3.bf16.msra.mxu0 %v2375_v13  ;;  %p2455_p4 = pnand %p2454_p3, %p2448_p0 }
0x1881   :  { %v2440_v61 = vpop.eup %2439 }
0x1882   :  { %1779 = vrot.lane.b32.xlu0 %v2440_v61, %s2474_s22 }
0x1883   :  { %v2442_v63 = vpop.eup %2441 }
0x1884   :  { %v1770_v0 = vadd.f32 1.0, %v2442_v63 }
0x1886   :  { %2443 = vrcp.f32 %v1770_v0 }
0x1890   :  { %v2444_v1 = vpop.eup %2443 }
0x1891   :  { %v1777_v5 = vmul.f32 %v2444_v1, %v1775_v4 }
0x18f4   :  { %v1780_v2 = vpop.permute.xlu0 %1779 }
0x18f5   :  { %v1782_v3 = vmul.f32 %v2444_v1, %v1780_v2 }
0x18f7   :  { %1784 = vrot.lane.b32.xlu1 %v1782_v3, %s2475_s23 }
0x1969   :  { %v1785_v6 = vpop.permute.xlu1 %1784 }
0x196a   :  { %v1787_v7 = vadd.f32 %v1785_v6, %v1777_v5 }
0x196c   :  { %2445 = vtanh.f32 %v1787_v7 }
0x1976   :  { %v2446_v14 = vpop.eup %2445 }
0x1977   :  { %1790 = vrot.lane.b32.xlu0 %v2446_v14, %s2474_s22 }
0x19e9   :  { %v1791_v16 = vpop.permute.xlu0 %1790 }
0x19ea   :  { %v1793_v17 = vmul.f32 %v2444_v1, %v1791_v16 }
0x19ec   :  { %v1806_v18 = vsel %vm1805_vm11, %v1804_v55, %v1793_v17 }
0x19ed   :  { %1808 = vrot.lane.b32.xlu1 %v1806_v18, %s2475_s23 }
0x1a5f   :  { %v1809_v19 = vpop.permute.xlu1 %1808 }
0x1a60   :  { %2210 = vmatmul.mubr.msk.f32.vlgmr.msra.gmra.mrb[18].mxu0 %vm162_vm2, %v1809_v19 }
0x1b33   :  { %v1878_v52 = vpop.f32.mrb[18].mxu0 }
0x1b34   :  { %v1879_v21 = vadd.f32 %v1878_v52, %v37_v20  ;;  %v2211_v12 = vpop.f32.mrb[19].mxu0 }
0x1b36   :  { %1882 = vst [vmem:[#allocation2] sm:$0xff] %v1879_v21 }
0x1b37   :  { %2458 = shalt.err (!%p2455_p4)
}
0x1b38   :  { %s2459_s15 = scalar_lea.hbm %s3064_s9, 128 }
0x1b39   :  { %p2460_p5 = scmp.ne.s32.totalorder %s3064_s9, %s2459_s15  ;;  %p2463_p6 = scmp.lt.u32.totalorder %s2459_s15, %s3064_s9 }
0x1b3b   :  { %p2465_p7 = pnand %p2463_p6, %p2460_p5 }
0x1b3d   :  { %2468 = shalt.err (!%p2465_p7)
}
0x1b3e   :  { %1894 = dma.vmem_to_hbm [thread:$0]  %s1892_s1, 128, %s3064_s9, [#allocation3]  }
0x1b3f   :  { %2469 = dma.done.wait [#allocation3], 128  }
0x1b40   :  { %2470 = vsyncadd [#allocation3], 4294967168 }
0x1b41   :  { %1900 = vsyncpa [#allocation3], 1 }

</bundles_post_ra>
